<compile_context>
chip_gen: v7x
topology: tpu7x:2x2x1
jax: 0.10.0
libtpu: 0.0.40
codegen_flags: <defaults>
</compile_context>

<pallas_src>
import functools
import math

import jax
import jax.numpy as jnp
from jax.experimental import pallas as pl
from jax.experimental.pallas import tpu as pltpu


_TARGET_BLOCK_ELEMS = 512 * 1024          # ~2 MiB of f32 per block buffer
_VMEM_LIMIT_BYTES = 32 * 1024 * 1024      # explicit scoped-VMEM limit
_MAX_OUTER = 8                            # parallel chunks for the fused reduction


def _round_up(x: int, m: int) -> int:
    return ((x + m - 1) // m) * m


def _pick_lanes(d: int) -> int:
    """Lane width: multiple of lcm(128, d) so channel == lane % d, ~1024 wide."""
    base = math.lcm(128, d)
    if base >= 1024:
        return base
    return base * (1024 // base)


def _buffered_spec(shape, index_map, depth):
    """BlockSpec with deeper input pipelining when the kwarg is available."""
    try:
        return pl.BlockSpec(shape, index_map, pipeline_mode=pl.Buffered(depth))
    except (TypeError, AttributeError):
        return pl.BlockSpec(shape, index_map)


def _lane_channel_mask(lanes: int, d: int):
    """(1, lanes) bool: True where the flat channel (== lane % d) is not 2."""
    lane = jax.lax.broadcasted_iota(jnp.int32, (1, lanes), 1)
    return (lane % d) != 2


def _elementwise_kernel(x_ref, t_ref, o_ref, *, d):
    diff = x_ref[...].astype(jnp.float32) - t_ref[...].astype(jnp.float32)
    is_sq = _lane_channel_mask(diff.shape[-1], d)      # broadcasts over rows
    # Note: select (not multiply-by-mask) -> identical to the reference for
    # finite inputs; differs only on non-finite diffs (0 * inf edge case).
    o_ref[...] = jnp.where(is_sq, diff * diff,
                           2.0 - 2.0 * jnp.cos(diff)).astype(o_ref.dtype)


def _sum_kernel(x_ref, t_ref, o_ref, *, d, rows_per_tile, total_rows, n_inner):
    o = pl.program_id(0)
    i = pl.program_id(1)

    @pl.when(i == 0)
    def _init():
        o_ref[...] = jnp.zeros_like(o_ref)

    diff = x_ref[...].astype(jnp.float32) - t_ref[...].astype(jnp.float32)
    lanes = diff.shape[-1]
    is_sq = _lane_channel_mask(lanes, d)

    # Row-level validity: masks stale rows of the ragged last tile and any
    # over-covered (clamped) tiles from the parallel/arbitrary grid split.
    row0 = (o * n_inner + i) * rows_per_tile
    row_ok = (row0 + jax.lax.broadcasted_iota(jnp.int32, (rows_per_tile, 1), 0)
              ) < total_rows

    val = jnp.where(is_sq, diff * diff, 2.0 - 2.0 * jnp.cos(diff))
    val = jnp.where(row_ok, val, 0.0)

    # Fold the tile onto an (8, LANES) slab: pure vreg adds, no per-step XLU
    # reduction, lane-dense resident-output accumulation.
    o_ref[...] += jnp.sum(val.reshape(rows_per_tile // 8, 8, lanes), axis=0)


def combined_loss(inputs: jax.Array, targets: jax.Array, reduction: str = "none"):
    assert inputs.shape == targets.shape
    assert inputs.ndim == 3, "expects (B, S, D) like the PyTorch module's mask indexing"
    B, S, D = inputs.shape
    assert D > 2, "module zeroes last-dim index 2, so D must be > 2"

    n = B * S * D
    lanes = _pick_lanes(D)

    pad = (-n) % lanes
    if pad:
        # Rare fallback (costs an extra copy pass).  Zero padding has diff == 0,
        # which contributes 0 to either branch, so sum/mean stay exact.
        x2d = jnp.pad(inputs.reshape(-1), (0, pad)).reshape(-1, lanes)
        t2d = jnp.pad(targets.reshape(-1), (0, pad)).reshape(-1, lanes)
    else:
        x2d = inputs.reshape(-1, lanes)
        t2d = targets.reshape(-1, lanes)

    total_rows = x2d.shape[0]
    target_rows = max(8, (_TARGET_BLOCK_ELEMS // lanes) // 8 * 8)
    rows_per_tile = min(target_rows, _round_up(total_rows, 8))
    n_tiles = -(-total_rows // rows_per_tile)

    if reduction == "none":
        blk = pl.BlockSpec((rows_per_tile, lanes), lambda i: (i, 0))
        out2d = pl.pallas_call(
            functools.partial(_elementwise_kernel, d=D),
            out_shape=jax.ShapeDtypeStruct((total_rows, lanes), inputs.dtype),
            grid_spec=pl.GridSpec(grid=(n_tiles,), in_specs=[blk, blk], out_specs=blk),
            compiler_params=pltpu.CompilerParams(
                dimension_semantics=("parallel",),
                vmem_limit_bytes=_VMEM_LIMIT_BYTES),
        )(x2d, t2d)
        if pad:
            return out2d.reshape(-1)[:n].reshape(B, S, D)
        return out2d.reshape(B, S, D)

    # Fused reduction: outer "parallel" axis (megacore / v7x 2-TC split) over
    # per-chunk partial sums, inner "arbitrary" reduction axis with a resident
    # lane-dense output accumulator.
    n_outer = min(_MAX_OUTER, n_tiles)
    n_inner = -(-n_tiles // n_outer)
    last_tile = n_tiles - 1

    def in_map(o, i):
        # Clamp over-covered tiles (n_outer * n_inner may exceed n_tiles); the
        # kernel's row_ok mask zeroes their contribution.
        return (jnp.minimum(o * n_inner + i, last_tile), 0)

    in_blk = _buffered_spec((rows_per_tile, lanes), in_map, depth=3)
    out_blk = pl.BlockSpec((8, lanes), lambda o, i: (o, 0))

    kernel = functools.partial(_sum_kernel, d=D, rows_per_tile=rows_per_tile,
                               total_rows=total_rows, n_inner=n_inner)
    partials = pl.pallas_call(
        kernel,
        out_shape=jax.ShapeDtypeStruct((n_outer * 8, lanes), jnp.float32),
        grid_spec=pl.GridSpec(grid=(n_outer, n_inner),
                              in_specs=[in_blk, in_blk], out_specs=out_blk),
        compiler_params=pltpu.CompilerParams(
            dimension_semantics=("parallel", "arbitrary"),
            vmem_limit_bytes=_VMEM_LIMIT_BYTES),
    )(x2d, t2d)

    total = jnp.sum(partials)   # tiny (<= 8 * MAX_OUTER * LANES f32) XLA reduce
    if reduction == "sum":
        return total.astype(inputs.dtype)
    elif reduction == "mean":
        return (total / n).astype(inputs.dtype)
    return total.astype(inputs.dtype)


def _reference(inputs, targets):
    # pure-JAX reference mirroring the PyTorch code exactly
    mask = jnp.ones(targets.shape, dtype=bool)
    mask = mask.at[:, :, 2].set(False)
    diff = inputs - targets
    return mask * jnp.square(diff) + (~mask) * (2.0 - 2.0 * jnp.cos(diff))


if __name__ == "__main__":
    key = jax.random.PRNGKey(0)

    def _check(shape):
        k1, k2 = jax.random.split(jax.random.fold_in(key, shape[1] * 131 + shape[2]))
        inputs = jax.random.normal(k1, shape, dtype=jnp.float32)
        targets = jax.random.normal(k2, shape, dtype=jnp.float32)
        ref = _reference(inputs, targets)

        out = jax.block_until_ready(combined_loss(inputs, targets, reduction="none"))
        assert out.shape == ref.shape
        assert jnp.allclose(out, ref, atol=1e-5, rtol=1e-5), f"elementwise mismatch {shape}"

        s = jax.block_until_ready(combined_loss(inputs, targets, reduction="sum"))
        assert jnp.allclose(s, jnp.sum(ref), atol=1e-3, rtol=1e-5), f"sum mismatch {shape}"

        m = jax.block_until_ready(combined_loss(inputs, targets, reduction="mean"))
        assert jnp.allclose(m, jnp.mean(ref), atol=1e-5, rtol=1e-5), f"mean mismatch {shape}"

    _check((2, 8, 4))      # small, exercises the padded-fallback path (D=4)
    _check((2, 128, 4))    # pad-free lane-dense path (n % LANES == 0)
    _check((2, 8, 3))      # D=3 -> LANES=768 (multiple of lcm(128, 3))

    print("KERNEL_OK")
</pallas_src>

<mosaic_0001>
module attributes {stable_mosaic.version = 11 : i64} {
  func.func @_elementwise_kernel(%arg0: i32, %arg1: memref<8x1024xf32, #tpu.memory_space<vmem>>, %arg2: memref<8x1024xf32, #tpu.memory_space<vmem>>, %arg3: memref<8x1024xf32, #tpu.memory_space<vmem>>) attributes {dimension_semantics = [#tpu.dimension_semantics<parallel>], iteration_bounds = array<i64: 1>, scalar_prefetch = 0 : i64, scratch_operands = 0 : i64, tpu.core_type = #tpu.core_type<tc>, window_params = [{transform_indices = @transform_0, window_bounds = array<i64: 8, 1024>}, {transform_indices = @transform_1, window_bounds = array<i64: 8, 1024>}, {transform_indices = @transform_2, window_bounds = array<i64: 8, 1024>}]} {
    %c0 = arith.constant 0 : index
    %c0_0 = arith.constant 0 : index
    %0 = vector.load %arg1[%c0, %c0_0] : memref<8x1024xf32, #tpu.memory_space<vmem>>, vector<8x1024xf32>
    %c0_1 = arith.constant 0 : index
    %c0_2 = arith.constant 0 : index
    %1 = vector.load %arg2[%c0_1, %c0_2] : memref<8x1024xf32, #tpu.memory_space<vmem>>, vector<8x1024xf32>
    %2 = arith.subf %0, %1 : vector<8x1024xf32>
    %3 = tpu.iota {dimensions = array<i32: 1>} : vector<1x1024xi32>
    %c4_i32 = arith.constant 4 : i32
    %c0_i32 = arith.constant 0 : i32
    %4 = arith.cmpi eq, %c4_i32, %c0_i32 : i32
    %c1_i32 = arith.constant 1 : i32
    %5 = arith.select %4, %c1_i32, %c4_i32 : i32
    %6 = vector.broadcast %5 : i32 to vector<1x1024xi32>
    %7 = arith.remsi %3, %6 : vector<1x1024xi32>
    %c0_i32_3 = arith.constant 0 : i32
    %8 = vector.broadcast %c0_i32_3 : i32 to vector<1x1024xi32>
    %9 = arith.cmpi ne, %7, %8 : vector<1x1024xi32>
    %c0_i32_4 = arith.constant 0 : i32
    %10 = vector.broadcast %c0_i32_4 : i32 to vector<1x1024xi32>
    %11 = arith.cmpi slt, %7, %10 : vector<1x1024xi32>
    %c0_i32_5 = arith.constant 0 : i32
    %12 = arith.cmpi slt, %5, %c0_i32_5 : i32
    %13 = vector.broadcast %12 : i1 to vector<1x1024xi1>
    %14 = vector.broadcast %13 : vector<1x1024xi1> to vector<1x1024xi1>
    %15 = arith.xori %11, %14 : vector<1x1024xi1>
    %16 = arith.andi %15, %9 : vector<1x1024xi1>
    %17 = vector.broadcast %5 : i32 to vector<1x1024xi32>
    %18 = arith.addi %7, %17 : vector<1x1024xi32>
    %19 = arith.select %16, %18, %7 : vector<1x1024xi1>, vector<1x1024xi32>
    %c2_i32 = arith.constant 2 : i32
    %20 = vector.broadcast %c2_i32 : i32 to vector<1x1024xi32>
    %21 = arith.cmpi ne, %19, %20 : vector<1x1024xi32>
    %22 = arith.mulf %2, %2 : vector<8x1024xf32>
    %23 = math.cos %2 : vector<8x1024xf32>
    %cst = arith.constant 2.000000e+00 : f32
    %24 = vector.broadcast %cst : f32 to vector<8x1024xf32>
    %25 = arith.mulf %24, %23 : vector<8x1024xf32>
    %cst_6 = arith.constant 2.000000e+00 : f32
    %26 = vector.broadcast %cst_6 : f32 to vector<8x1024xf32>
    %27 = arith.subf %26, %25 : vector<8x1024xf32>
    %28 = vector.shape_cast %21 : vector<1x1024xi1> to vector<1x1024xi1>
    %29 = vector.broadcast %28 : vector<1x1024xi1> to vector<8x1024xi1>
    %30 = arith.select %29, %22, %27 : vector<8x1024xi1>, vector<8x1024xf32>
    %c0_7 = arith.constant 0 : index
    %c0_8 = arith.constant 0 : index
    %31 = vector.load %arg3[%c0_7, %c0_8] : memref<8x1024xf32, #tpu.memory_space<vmem>>, vector<8x1024xf32>
    tpu.vector_store %arg3[%c0_7, %c0_8], %30 {strides = array<i32>} : memref<8x1024xf32, #tpu.memory_space<vmem>>, vector<8x1024xf32>,
    return
  }
  func.func @transform_0(%arg0: i32) -> (i32, i32) {
    %c0_i32 = arith.constant 0 : i32
    %c0_i32_0 = arith.constant 0 : i32
    return %arg0, %c0_i32 : i32, i32
  }
  func.func @transform_1(%arg0: i32) -> (i32, i32) {
    %c0_i32 = arith.constant 0 : i32
    %c0_i32_0 = arith.constant 0 : i32
    return %arg0, %c0_i32 : i32, i32
  }
  func.func @transform_2(%arg0: i32) -> (i32, i32) {
    %c0_i32 = arith.constant 0 : i32
    %c0_i32_0 = arith.constant 0 : i32
    return %arg0, %c0_i32 : i32, i32
  }
}

</mosaic_0001>

<bundles_post_ra>
// kernel: tpu_custom_call.1
= control target key start
LH: loop header
LB: loop body
LE: loop exit
PB: predicated region body
PF: predicated region fallthrough
CT: control target
= control target key end

     0   :  { %7 = vsyncpa [#allocation3], 0  ;;  %s2799_s0 = inlined_call_operand.hbm [shape: f32[1,1024], index: 0, kind: input, shape index: {}]   ;;  %s2800_s1 = inlined_call_operand.hbm [shape: f32[1,1024], index: 1, kind: input, shape index: {}]   ;;  %s2801_s2 = inlined_call_operand.hbm [shape: f32[1,1024], index: 2, kind: output, shape index: {}]  }
   0x1   :  { %8 = vsyncpa [#allocation6], 0 }
   0x2   :  { %9 = vsyncpa [#allocation4], 0 }
   0x3   :  { %14 = vsyncadd [#allocation3], 896  ;;  %s1711_s9 = smov [#allocation2]   ;;  %s1639_s13 = scalar_lea.hbm %s2799_s0, 128 }
   0x4   :  { %s15_s10 = sshll.u32 %s1711_s9, 4  ;;  %p1640_p0 = scmp.ne.s32.totalorder %s2799_s0, %s1639_s13  ;;  %s16_s10 = int_to_ptr.vmem [resolvable:$true] %s15_s10 }
   0x5   :  { %p1643_p1 = scmp.lt.u32.totalorder %s1639_s13, %s2799_s0 }
   0x7   :  { %p1645_p2 = pnand %p1643_p1, %p1640_p0 }
   0x9   :  { %1648 = shalt.err (!%p1645_p2)
}
   0xa   :  { %s1649_s18 = scalar_lea.vmem %s16_s10, 128  ;;  %s1653_s19 = scalar_lea.vmem %s16_s10, 1024 }
   0xb   :  { %p1650_p3 = scmp.ne.s32.totalorder %s16_s10, %s1649_s18  ;;  %p1654_p4 = scmp.lt.s32.totalorder %s16_s10, %s16_s10 }
   0xc   :  { %p1655_p5 = scmp.lt.s32.totalorder %s1653_s19, %s1649_s18 }
   0xe   :  { %p1656_p6 = por %p1655_p5, %p1654_p4 }
  0x10   :  { %p1657_p7 = pnand %p1656_p6, %p1650_p3 }
  0x12   :  { %1660 = shalt.err (!%p1657_p7)
}
  0x13   :  { %s1712_s20 = smov 128   ;;  %s1713_s21 = smov 8  }
  0x14   :  { %21 = dma.hbm_to_vmem [thread:$0]  %s2799_s0, 128, %s16_s10, [#allocation3], %s1712_s20, %s1712_s20, %s1713_s21  }
  0x15   :  { %26 = vsyncadd [#allocation6], 896  ;;  %s1714_s24 = smov [#allocation5]   ;;  %s1661_s28 = scalar_lea.hbm %s2800_s1, 128 }
  0x16   :  { %s27_s25 = sshll.u32 %s1714_s24, 4  ;;  %p1662_p8 = scmp.ne.s32.totalorder %s2800_s1, %s1661_s28  ;;  %s28_s25 = int_to_ptr.vmem [resolvable:$true] %s27_s25 }
  0x17   :  { %p1665_p9 = scmp.lt.u32.totalorder %s1661_s28, %s2800_s1 }
  0x19   :  { %p1667_p10 = pnand %p1665_p9, %p1662_p8 }
  0x1b   :  { %1670 = shalt.err (!%p1667_p10)
}
  0x1c   :  { %s1671_s5 = scalar_lea.vmem %s28_s25, 128  ;;  %s1675_s0 = scalar_lea.vmem %s28_s25, 1024 }
  0x1d   :  { %p1672_p11 = scmp.ne.s32.totalorder %s28_s25, %s1671_s5  ;;  %p1676_p12 = scmp.lt.s32.totalorder %s28_s25, %s28_s25 }
  0x1e   :  { %p1677_p13 = scmp.lt.s32.totalorder %s1675_s0, %s1671_s5 }
  0x20   :  { %p1678_p0 = por %p1677_p13, %p1676_p12 }
  0x22   :  { %p1679_p1 = pnand %p1678_p0, %p1672_p11 }
  0x24   :  { %1682 = shalt.err (!%p1679_p1)
}
  0x25   :  { %33 = dma.hbm_to_vmem [thread:$0]  %s2800_s1, 128, %s28_s25, [#allocation6], %s1712_s20, %s1712_s20, %s1713_s21  }
  0x26   :  { %1705 = dma.done.wait [#allocation3], 1024  }
  0x27   :  { %1706 = vsyncadd [#allocation3], 4294966272 }
  0x28   :  { %1707 = dma.done.wait [#allocation6], 1024  }
  0x29   :  { %1708 = vsyncadd [#allocation6], 4294966272  ;;  %v40_v0 = vld [vmem:[#allocation2] sm:$0xff]  ;;  %v41_v2 = vld [vmem:[#allocation2 + $0x8] sm:$0xff]  ;;  %v2815_v23 = vmov 683565275  }
  0x2a   :  { %v48_v1 = vld [vmem:[#allocation5] sm:$0xff]  ;;  %v49_v3 = vld [vmem:[#allocation5 + $0x8] sm:$0xff]  ;;  %v42_v11 = vld [vmem:[#allocation2 + $0x10] sm:$0xff]  ;;  %v2813_v25 = vmov 2475754826  }
  0x2b   :  { %v1768_v4 = vsub.f32 %v40_v0, %v48_v1  ;;  %v1770_v5 = vsub.f32 %v41_v2, %v49_v3  ;;  %v50_v12 = vld [vmem:[#allocation5 + $0x10] sm:$0xff]  ;;  %v2809_v27 = vmov 2102212464   ;;  %v2819_v29 = vmov 920167782  }
  0x2c   :  { %v1774_v15 = vsub.f32 %v42_v11, %v50_v12  ;;  %v2811_v32 = vmov 2131351028   ;;  %v2817_v37 = vmov 1326507024  }
  0x2d   :  { %v188_v6 = vand.u32 2139095040, %v1768_v4  ;;  %v291_v8 = vand.u32 2139095040, %v1770_v5  ;;  %v2807_v19 = vand.u32 2147483647, %v1768_v4  ;;  %v2806_v61 = vand.u32 2147483647, %v1770_v5 }
  0x2e   :  { %v394_v22 = vand.u32 2139095040, %v1774_v15 }
  0x2f   :  { %v189_v7 = vshrl.u32 %v188_v6, 23  ;;  %v292_v10 = vshrl.u32 %v291_v8, 23  ;;  %v192_v39 = vand.u32 8388607, %v2807_v19  ;;  %v51_v8 = vld [vmem:[#allocation5 + $0x18] sm:$0xff] }
  0x30   :  { %v395_v41 = vshrl.u32 %v394_v22, 23 }
  0x31   :  { %v1531_v9 = vadd.s32 4294967169, %v189_v7  ;;  %v1535_v14 = vadd.s32 4294967169, %v292_v10  ;;  %v193_v49 = vor.u32 8388608, %v192_v39  ;;  %v43_v7 = vld [vmem:[#allocation2 + $0x18] sm:$0xff] }
  0x32   :  { %v1539_v51 = vadd.s32 4294967169, %v395_v41 }
  0x33   :  { %v195_v13 = vadd.s32 1, %v1531_v9  ;;  %v298_v16 = vadd.s32 1, %v1535_v14  ;;  %v1811_v57 = vshll.u32 %v193_v49, 8 }
  0x34   :  { %v401_v58 = vadd.s32 1, %v1539_v51 }
  0x35   :  { %vm196_vm0 = vcmp.gt.s32.totalorder %v195_v13, 0  ;;  %vm299_vm1 = vcmp.gt.s32.totalorder %v298_v16, 0 }
  0x36   :  { %v197_v17 = vsel %vm196_vm0, %v195_v13, 0  ;;  %v300_v40 = vsel %vm299_vm1, %v298_v16, 0  ;;  %vm402_vm6 = vcmp.gt.s32.totalorder %v401_v58, 0 }
  0x37   :  { %v199_v18 = vand.u32 31, %v197_v17  ;;  %v1777_v20 = vshrl.u32 %v197_v17, 5  ;;  %v302_v48 = vand.u32 31, %v300_v40  ;;  %v1819_v63 = vshrl.u32 %v300_v40, 5 }
  0x38   :  { %v403_v22 = vsel %vm402_vm6, %v401_v58, 0 }
  0x39   :  { %v200_v21 = vsub.s32 32, %v199_v18  ;;  %v202_v24 = vshll.u32 %v2815_v23, %v199_v18  ;;  %v205_v26 = vshll.u32 %v2813_v25, %v199_v18  ;;  %v211_v28 = vshll.u32 %v2809_v27, %v199_v18 }
  0x3a   :  { %v214_v30 = vshll.u32 %v2819_v29, %v199_v18  ;;  %v208_v34 = vshll.u32 %v2811_v32, %v199_v18  ;;  %vm220_vm2 = vcmp.lt.s32.totalorder %v1777_v20, 4  ;;  %vm217_vm3 = vcmp.lt.s32.totalorder %v1777_v20, 1 }
  0x3b   :  { %v203_v31 = vshrl.u32 %v2813_v25, %v200_v21  ;;  %v206_v33 = vshrl.u32 %v2811_v32, %v200_v21  ;;  %v209_v35 = vshrl.u32 %v2809_v27, %v200_v21  ;;  %v212_v36 = vshrl.u32 %v2819_v29, %v200_v21 }
  0x3c   :  { %v215_v38 = vshrl.u32 %v2817_v37, %v200_v21  ;;  %vm219_vm4 = vcmp.lt.s32.totalorder %v1777_v20, 3  ;;  %vm218_vm5 = vcmp.lt.s32.totalorder %v1777_v20, 2  ;;  %v1809_v56 = vsub.s32 32, %v302_v48 }
  0x3d   :  { %v213_v42 = vor.u32 %v212_v36, %v211_v28  ;;  %v204_v44 = vor.u32 %v203_v31, %v202_v24  ;;  %v207_v45 = vor.u32 %v206_v33, %v205_v26  ;;  %v210_v46 = vor.u32 %v209_v35, %v208_v34 }
  0x3e   :  { %v216_v43 = vor.u32 %v215_v38, %v214_v30  ;;  %v201_v62 = vshrl.u32 %v2815_v23, %v200_v21  ;;  %v314_v0 = vshll.u32 %v2809_v27, %v302_v48  ;;  %v315_v1 = vshrl.u32 %v2819_v29, %v1809_v56 }
  0x3f   :  { %v226_v47 = vsel %vm220_vm2, %v213_v42, 920167782  ;;  %v225_v52 = vsel %vm217_vm3, %v204_v44, %v207_v45  ;;  %v229_v54 = vsel %vm217_vm3, %v207_v45, %v210_v46  ;;  %v222_v2 = vsel %vm220_vm2, %v210_v46, 2102212464 }
  0x40   :  { %v230_v50 = vsel %vm220_vm2, %v216_v43, 1326507024  ;;  %v227_v53 = vsel %vm219_vm4, %v210_v46, %v226_v47  ;;  %v305_v11 = vshll.u32 %v2815_v23, %v302_v48  ;;  %v306_v12 = vshrl.u32 %v2813_v25, %v1809_v56 }
  0x41   :  { %v231_v55 = vsel %vm219_vm4, %v213_v42, %v230_v50  ;;  %v228_v59 = vsel %vm218_vm5, %v225_v52, %v227_v53  ;;  %v308_v13 = vshll.u32 %v2813_v25, %v302_v48  ;;  %v309_v14 = vshrl.u32 %v2811_v32, %v1809_v56 }
  0x42   :  { %v232_v60 = vsel %vm218_vm5, %v229_v54, %v231_v55  ;;  %v1827_v3 = vmul.u32.u64.low %v1811_v57, %v228_v59  ;;  %v1828_v6 = vmul.u32.u64.high %v1811_v57, %v228_v59, %v1827_v3  ;;  %v311_v16 = vshll.u32 %v2811_v32, %v302_v48 }
  0x43   :  { %v1832_v9 = vmul.u32.u64.low %v1811_v57, %v232_v60  ;;  %v1833_v10 = vmul.u32.u64.high %v1811_v57, %v232_v60, %v1832_v9  ;;  %v312_v17 = vshrl.u32 %v2809_v27, %v1809_v56  ;;  %v295_v18 = vand.u32 8388607, %v2806_v61 }
  0x44   :  { %v316_v21 = vor.u32 %v315_v1, %v314_v0  ;;  %v1846_v24 = vsub.f32 %v43_v7, %v51_v8  ;;  %vm323_vm7 = vcmp.lt.s32.totalorder %v1819_v63, 4  ;;  %v221_v26 = vsel %vm217_vm3, %v201_v62, %v204_v44 }
  0x45   :  { %v223_v28 = vsel %vm219_vm4, %v207_v45, %v222_v2  ;;  %v317_v30 = vshll.u32 %v2819_v29, %v302_v48  ;;  %v318_v31 = vshrl.u32 %v2817_v37, %v1809_v56  ;;  %v1856_v33 = vor.u32 %v306_v12, %v305_v11 }
  0x46   :  { %v1858_v34 = vor.u32 %v309_v14, %v308_v13  ;;  %v313_v35 = vor.u32 %v312_v17, %v311_v16  ;;  %v405_v36 = vand.u32 31, %v403_v22  ;;  %v296_v38 = vor.u32 8388608, %v295_v18 }
  0x47   :  { %vm320_vm8 = vcmp.lt.s32.totalorder %v1819_v63, 1  ;;  %vm322_vm9 = vcmp.lt.s32.totalorder %v1819_v63, 3  ;;  %v329_v39 = vsel %vm323_vm7, %v316_v21, 920167782  ;;  %v243_v40 = vadd.s32 1, %v1828_v6 }
  0x48   :  { %v497_v41 = vand.u32 2139095040, %v1846_v24  ;;  %v224_v42 = vsel %vm218_vm5, %v221_v26, %v223_v28  ;;  %vm242_vm10 = vc.u32 %v1833_v10, %v1827_v3  ;;  %v319_v43 = vor.u32 %v318_v31, %v317_v30 }
  0x49   :  { %vm321_vm11 = vcmp.lt.s32.totalorder %v1819_v63, 2  ;;  %v328_v44 = vsel %vm320_vm8, %v1856_v33, %v1858_v34  ;;  %v330_v45 = vsel %vm322_vm9, %v313_v35, %v329_v39  ;;  %v406_v46 = vsub.s32 32, %v405_v36 }
  0x4a   :  { %v1877_v47 = vshll.u32 %v296_v38, 8  ;;  %v2805_v20 = vand.u32 2147483647, %v1774_v15  ;;  %v240_v48 = vmul.u32 %v1811_v57, %v224_v42  ;;  %v244_v49 = vsel %vm242_vm10, %v243_v40, %v1828_v6 }
  0x4b   :  { %v417_v50 = vshll.u32 %v2809_v27, %v405_v36  ;;  %v498_v51 = vshrl.u32 %v497_v41, 23  ;;  %v331_v52 = vsel %vm321_vm11, %v328_v44, %v330_v45  ;;  %v333_v53 = vsel %vm323_vm7, %v319_v43, 1326507024 }
  0x4c   :  { %v1887_v54 = vshrl.u32 %v403_v22, 5  ;;  %v408_v55 = vshll.u32 %v2815_v23, %v405_v36  ;;  %v409_v58 = vshrl.u32 %v2813_v25, %v406_v46  ;;  %v411_v59 = vshll.u32 %v2813_v25, %v405_v36 }
  0x4d   :  { %v412_v57 = vshrl.u32 %v2811_v32, %v406_v46  ;;  %v418_v60 = vshrl.u32 %v2819_v29, %v406_v46  ;;  %v414_v62 = vshll.u32 %v2811_v32, %v405_v36  ;;  %v415_v0 = vshrl.u32 %v2809_v27, %v406_v46 }
  0x4e   :  { %v420_v1 = vshll.u32 %v2819_v29, %v405_v36  ;;  %v421_v2 = vshrl.u32 %v2817_v37, %v406_v46  ;;  %v332_v6 = vsel %vm320_vm8, %v1858_v34, %v313_v35  ;;  %v334_v7 = vsel %vm322_vm9, %v316_v21, %v333_v53 }
  0x4f   :  { %v419_v8 = vor.u32 %v418_v60, %v417_v50  ;;  %v1543_v9 = vadd.s32 4294967169, %v498_v51  ;;  %v398_v11 = vand.u32 8388607, %v2805_v20  ;;  %vm426_vm12 = vcmp.lt.s32.totalorder %v1887_v54, 4 }
  0x50   :  { %v245_v12 = vadd.s32 %v244_v49, %v240_v48  ;;  %v1907_v13 = vmul.u32.u64.low %v1877_v47, %v331_v52  ;;  %v1908_v14 = vmul.u32.u64.high %v1877_v47, %v331_v52, %v1907_v13  ;;  %v422_v16 = vor.u32 %v421_v2, %v420_v1 }
  0x51   :  { %v335_v17 = vsel %vm321_vm11, %v332_v6, %v334_v7  ;;  %v410_v18 = vor.u32 %v409_v58, %v408_v55  ;;  %v413_v22 = vor.u32 %v412_v57, %v411_v59  ;;  %v416_v21 = vor.u32 %v415_v0, %v414_v62 }
  0x52   :  { %vm423_vm13 = vcmp.lt.s32.totalorder %v1887_v54, 1  ;;  %vm425_vm14 = vcmp.lt.s32.totalorder %v1887_v54, 3  ;;  %v432_v26 = vsel %vm426_vm12, %v419_v8, 920167782  ;;  %v504_v28 = vadd.s32 1, %v1543_v9 }
  0x53   :  { %v304_v30 = vshrl.u32 %v2815_v23, %v1809_v56  ;;  %v325_v31 = vsel %vm323_vm7, %v313_v35, 2102212464  ;;  %v399_v36 = vor.u32 8388608, %v398_v11  ;;  %vm424_vm15 = vcmp.lt.s32.totalorder %v1887_v54, 2 }
  0x54   :  { %v1922_v38 = vmul.u32.u64.low %v1877_v47, %v335_v17  ;;  %v1923_v39 = vmul.u32.u64.high %v1877_v47, %v335_v17, %v1922_v38  ;;  %v436_v40 = vsel %vm426_vm12, %v422_v16, 1326507024  ;;  %v431_v41 = vsel %vm423_vm13, %v410_v18, %v413_v22 }
  0x55   :  { %v433_v42 = vsel %vm425_vm14, %v416_v21, %v432_v26  ;;  %v435_v56 = vsel %vm423_vm13, %v413_v22, %v416_v21  ;;  %v437_v35 = vsel %vm425_vm14, %v419_v8, %v436_v40  ;;  %v246_v43 = vadd.s32 536870912, %v245_v12 }
  0x56   :  { %vm505_vm0 = vcmp.gt.s32.totalorder %v504_v28, 0  ;;  %v324_v44 = vsel %vm320_vm8, %v304_v30, %v1856_v33  ;;  %v326_v45 = vsel %vm322_vm9, %v1858_v34, %v325_v31  ;;  %v439_v48 = vshll.u32 %v399_v36, 8  ;;  %v44_v31 = vld [vmem:[#allocation2 + $0x20] sm:$0xff] }
  0x57   :  { %v434_v49 = vsel %vm424_vm15, %v431_v41, %v433_v42  ;;  %v438_v50 = vsel %vm424_vm15, %v435_v56, %v437_v35  ;;  %v506_v51 = vsel %vm505_vm0, %v504_v28, 0  ;;  %v1946_v52 = vshrl.u32 %v246_v43, 30  ;;  %v52_v36 = vld [vmem:[#allocation5 + $0x20] sm:$0xff] }
  0x58   :  { %v327_v53 = vsel %vm321_vm11, %v324_v44, %v326_v45  ;;  %v346_v55 = vadd.s32 1, %v1908_v14  ;;  %v407_v33 = vshrl.u32 %v2815_v23, %v406_v46  ;;  %vm345_vm1 = vc.u32 %v1923_v39, %v1907_v13 }
  0x59   :  { %v1952_v58 = vmul.u32.u64.low %v439_v48, %v438_v50  ;;  %v1953_v59 = vmul.u32.u64.high %v439_v48, %v438_v50, %v1952_v58  ;;  %v1955_v34 = vmul.u32.u64.low %v439_v48, %v434_v49  ;;  %v1956_v57 = vmul.u32.u64.high %v439_v48, %v434_v49, %v1955_v34 }
  0x5a   :  { %v428_v60 = vsel %vm426_vm12, %v416_v21, 2102212464  ;;  %v508_v62 = vand.u32 31, %v506_v51  ;;  %v248_v63 = vshll.u32 %v1946_v52, 30  ;;  %v343_v0 = vmul.u32 %v1877_v47, %v327_v53 }
  0x5b   :  { %v347_v46 = vsel %vm345_vm1, %v346_v55, %v1908_v14  ;;  %v427_v1 = vsel %vm423_vm13, %v407_v33, %v410_v18  ;;  %v429_v2 = vsel %vm425_vm14, %v413_v22, %v428_v60  ;;  %v2804_v7 = vand.u32 2147483647, %v1846_v24 }
  0x5c   :  { %v509_v6 = vsub.s32 32, %v508_v62  ;;  %v1971_v8 = vsub.s32 %v245_v12, %v248_v63  ;;  %v348_v9 = vadd.s32 %v347_v46, %v343_v0  ;;  %v430_v11 = vsel %vm424_vm15, %v427_v1, %v429_v2 }
  0x5d   :  { %v1975_v16 = vshrl.u32 %v506_v51, 5  ;;  %vm448_vm2 = vc.u32 %v1953_v59, %v1955_v34  ;;  %v449_v47 = vadd.s32 1, %v1956_v57  ;;  %v511_v14 = vshll.u32 %v2815_v23, %v508_v62 }
  0x5e   :  { %v520_v17 = vshll.u32 %v2809_v27, %v508_v62  ;;  %v512_v18 = vshrl.u32 %v2813_v25, %v509_v6  ;;  %v514_v12 = vshll.u32 %v2813_v25, %v508_v62  ;;  %v515_v22 = vshrl.u32 %v2811_v32, %v509_v6 }
  0x5f   :  { %v517_v54 = vshll.u32 %v2811_v32, %v508_v62  ;;  %v518_v21 = vshrl.u32 %v2809_v27, %v509_v6  ;;  %v521_v26 = vshrl.u32 %v2819_v29, %v509_v6  ;;  %v523_v28 = vshll.u32 %v2819_v29, %v508_v62 }
  0x60   :  { %v524_v30 = vshrl.u32 %v2817_v37, %v509_v6  ;;  %v251_v38 = vsub.s32 0, %v1971_v8  ;;  %v349_v40 = vadd.s32 536870912, %v348_v9  ;;  %v501_v41 = vand.u32 8388607, %v2804_v7 }
  0x61   :  { %v446_v42 = vmul.u32 %v439_v48, %v430_v11  ;;  %v522_v56 = vor.u32 %v521_v26, %v520_v17  ;;  %vm529_vm3 = vcmp.lt.s32.totalorder %v1975_v16, 4  ;;  %v450_v43 = vsel %vm448_vm2, %v449_v47, %v1956_v57 }
  0x62   :  { %v525_v35 = vor.u32 %v524_v30, %v523_v28  ;;  %v1998_v44 = vsub.f32 %v44_v31, %v52_v36  ;;  %v513_v45 = vor.u32 %v512_v18, %v511_v14  ;;  %v516_v49 = vor.u32 %v515_v22, %v514_v12 }
  0x63   :  { %v519_v50 = vor.u32 %v518_v21, %v517_v54  ;;  %v2000_v51 = vshrl.u32 %v349_v40, 30  ;;  %vm526_vm4 = vcmp.lt.s32.totalorder %v1975_v16, 1  ;;  %vm528_vm5 = vcmp.lt.s32.totalorder %v1975_v16, 3 }
  0x64   :  { %v535_v48 = vsel %vm529_vm3, %v522_v56, 920167782  ;;  %v1532_v53 = vmin.u32 %v251_v38, %v1971_v8  ;;  %v451_v55 = vadd.s32 %v450_v43, %v446_v42  ;;  %v502_v33 = vor.u32 8388608, %v501_v41  ;;  %v53_v41 = vld [vmem:[#allocation5 + $0x28] sm:$0xff] }
  0x65   :  { %v539_v58 = vsel %vm529_vm3, %v525_v35, 1326507024  ;;  %vm527_vm6 = vcmp.lt.s32.totalorder %v1975_v16, 2  ;;  %v534_v57 = vsel %vm526_vm4, %v513_v45, %v516_v49  ;;  %v536_v60 = vsel %vm528_vm5, %v519_v50, %v535_v48 }
  0x66   :  { %v600_v62 = vand.u32 2139095040, %v1998_v44  ;;  %v351_v63 = vshll.u32 %v2000_v51, 30  ;;  %v538_v0 = vsel %vm526_vm4, %v516_v49, %v519_v50  ;;  %v540_v46 = vsel %vm528_vm5, %v522_v56, %v539_v58 }
  0x67   :  { %v253_v1 = vclz %v1532_v53  ;;  %v452_v2 = vadd.s32 536870912, %v451_v55  ;;  %v2020_v11 = vshll.u32 %v502_v33, 8  ;;  %v2802_v47 = vlaneseq }
  0x68   :  { %v537_v14 = vsel %vm527_vm6, %v534_v57, %v536_v60  ;;  %v541_v17 = vsel %vm527_vm6, %v538_v0, %v540_v46  ;;  %v601_v18 = vshrl.u32 %v600_v62, 23  ;;  %v2029_v22 = vsub.s32 %v348_v9, %v351_v63  ;;  %v45_v9 = vld [vmem:[#allocation2 + $0x28] sm:$0xff] }
  0x69   :  { %v2027_v12 = vand.u32 127, %v2802_v47  ;;  %v1533_v54 = vadd.s32 4294967294, %v253_v1  ;;  %v2031_v21 = vshrl.u32 %v452_v2, 30  ;;  %v510_v30 = vshrl.u32 %v2815_v23, %v509_v6 }
  0x6a   :  { %v2034_v26 = vmul.u32.u64.low %v2020_v11, %v537_v14  ;;  %v2035_v28 = vmul.u32.u64.high %v2020_v11, %v537_v14, %v2034_v26  ;;  %v2040_v31 = vmul.u32.u64.low %v2020_v11, %v541_v17  ;;  %v2041_v36 = vmul.u32.u64.high %v2020_v11, %v541_v17, %v2040_v31 }
  0x6b   :  { %2834 = vst [vmem:[#allocation11_spill] sm:$0xff] %v2027_v12  ;;  %v531_v38 = vsel %vm529_vm3, %v519_v50, 2102212464  ;;  %v1547_v40 = vadd.s32 4294967169, %v601_v18  ;;  %v2046_v42 = vadd.s32 128, %v2027_v12  ;;  %v354_v56 = vsub.s32 0, %v2029_v22 }
  0x6c   :  { %v2050_v35 = vadd.s32 256, %v2027_v12  ;;  %vm1534_vm7 = vcmp.lt.s32.totalorder %v1533_v54, 0  ;;  %v454_v6 = vshll.u32 %v2031_v21, 30  ;;  %v2054_v48 = vadd.s32 384, %v2027_v12 }
  0x6d   :  { %2835 = vst [vmem:[#allocation12_spill] sm:$0xff] %v2046_v42  ;;  %v607_v43 = vadd.s32 1, %v1547_v40  ;;  %v2057_v50 = vadd.s32 512, %v2027_v12  ;;  %v530_v53 = vsel %vm526_vm4, %v510_v30, %v513_v45  ;;  %v532_v33 = vsel %vm528_vm5, %v516_v49, %v531_v38 }
  0x6e   :  { %2836 = vst [vmem:[#allocation13_spill] sm:$0xff] %v2050_v35  ;;  %2837 = vst [vmem:[#allocation14_spill] sm:$0xff] %v2054_v48  ;;  %v2063_v58 = vsub.f32 %v45_v9, %v53_v41  ;;  %v2066_v57 = vadd.s32 640, %v2027_v12  ;;  %v2803_v60 = vand.u32 2147483647, %v1998_v44  ;;  %v2070_v62 = vadd.s32 768, %v2027_v12 }
  0x6f   :  { %2838 = vst [vmem:[#allocation15_spill] sm:$0xff] %v2057_v50  ;;  %vm608_vm8 = vcmp.gt.s32.totalorder %v607_v43, 0  ;;  %v2072_v63 = vsel %vm1534_vm7, 0, %v1533_v54  ;;  %v1536_v0 = vmin.u32 %v354_v56, %v2029_v22  ;;  %v2075_v45 = vsub.s32 %v451_v55, %v454_v6 }
  0x70   :  { %2839 = vst [vmem:[#allocation16_spill] sm:$0xff] %v2066_v57  ;;  %2840 = vst [vmem:[#allocation17_spill] sm:$0xff] %v2070_v62  ;;  %v609_v46 = vsel %vm608_vm8, %v607_v43, 0  ;;  %v533_v49 = vsel %vm527_vm6, %v530_v53, %v532_v33  ;;  %v552_v1 = vadd.s32 1, %v2035_v28  ;;  %v2081_v14 = vadd.s32 896, %v2027_v12 }
  0x71   :  { %v611_v2 = vand.u32 31, %v609_v46  ;;  %vm551_vm9 = vc.u32 %v2041_v36, %v2034_v26  ;;  %v604_v55 = vand.u32 8388607, %v2803_v60  ;;  %v703_v30 = vand.u32 2139095040, %v2063_v58 }
  0x72   :  { %2841 = vst [vmem:[#allocation18_spill] sm:$0xff] %v2081_v14  ;;  %v241_v31 = vadd.s32 %v1827_v3, %v1833_v10  ;;  %v257_v38 = vsub.s32 32, %v2072_v63  ;;  %v261_v40 = vsub.s32 4294967266, %v2072_v63  ;;  %v549_v9 = vmul.u32 %v2020_v11, %v533_v49 }
  0x73   :  { %v612_v16 = vsub.s32 32, %v611_v2  ;;  %v356_v41 = vclz %v1536_v0  ;;  %v457_v56 = vsub.s32 0, %v2075_v45  ;;  %v553_v6 = vsel %vm551_vm9, %v552_v1, %v2035_v28 }
  0x74   :  { %v614_v43 = vshll.u32 %v2815_v23, %v611_v2  ;;  %v617_v33 = vshll.u32 %v2813_v25, %v611_v2  ;;  %v620_v3 = vshll.u32 %v2811_v32, %v611_v2  ;;  %v258_v10 = vshll.u32 %v1971_v8, %v2072_v63 }
  0x75   :  { %v615_v53 = vshrl.u32 %v2813_v25, %v612_v16  ;;  %v618_v18 = vshrl.u32 %v2811_v32, %v612_v16  ;;  %v605_v54 = vor.u32 8388608, %v604_v55  ;;  %v621_v11 = vshrl.u32 %v2809_v27, %v612_v16 }
  0x76   :  { %v704_v0 = vshrl.u32 %v703_v30, 23  ;;  %v2106_v49 = vadd.s32 %v553_v6, %v549_v9  ;;  %v610_v28 = vshrl.u32 %v609_v46, 5  ;;  %v623_v1 = vshll.u32 %v2809_v27, %v611_v2 }
  0x77   :  { %v624_v17 = vshrl.u32 %v2819_v29, %v612_v16  ;;  %v262_v47 = vadd.s32 127, %v261_v40  ;;  %v1537_v60 = vadd.s32 4294967294, %v356_v41  ;;  %v1540_v7 = vmin.u32 %v457_v56, %v2075_v45 }
  0x78   :  { %v613_v20 = vshrl.u32 %v2815_v23, %v612_v16  ;;  %v616_v61 = vor.u32 %v615_v53, %v614_v43  ;;  %v619_v19 = vor.u32 %v618_v18, %v617_v33  ;;  %v622_v8 = vor.u32 %v621_v11, %v620_v3 }
  0x79   :  { %v625_v63 = vor.u32 %v624_v17, %v623_v1  ;;  %v626_v55 = vshll.u32 %v2819_v29, %v611_v2  ;;  %v627_v30 = vshrl.u32 %v2817_v37, %v612_v16  ;;  %v645_v9 = vshll.u32 %v605_v54, 8 }
  0x7a   :  { %v1551_v46 = vadd.s32 4294967169, %v704_v0  ;;  %v555_v6 = vadd.s32 536870912, %v2106_v49  ;;  %vm629_vm10 = vcmp.lt.s32.totalorder %v610_v28, 1  ;;  %vm631_vm11 = vcmp.lt.s32.totalorder %v610_v28, 3 }
  0x7b   :  { %vm632_vm12 = vcmp.lt.s32.totalorder %v610_v28, 4  ;;  %v628_v40 = vor.u32 %v627_v30, %v626_v55  ;;  %vm630_vm13 = vcmp.lt.s32.totalorder %v610_v28, 2  ;;  %v633_v41 = vsel %vm629_vm10, %v613_v20, %v616_v61 }
  0x7c   :  { %v634_v56 = vsel %vm632_vm12, %v622_v8, 2102212464  ;;  %v637_v18 = vsel %vm629_vm10, %v616_v61, %v619_v19  ;;  %v638_v53 = vsel %vm632_vm12, %v625_v63, 920167782  ;;  %v641_v17 = vsel %vm629_vm10, %v619_v19, %v622_v8 }
  0x7d   :  { %v635_v43 = vsel %vm631_vm11, %v619_v19, %v634_v56  ;;  %v259_v33 = vshrl.u32 %v241_v31, %v257_v38  ;;  %v639_v2 = vsel %vm631_vm11, %v622_v8, %v638_v53  ;;  %v642_v16 = vsel %vm632_vm12, %v628_v40, 1326507024 }
  0x7e   :  { %v710_v54 = vadd.s32 1, %v1551_v46  ;;  %v263_v3 = vshll.u32 %v262_v47, 23  ;;  %vm1538_vm14 = vcmp.lt.s32.totalorder %v1537_v60, 0  ;;  %v640_v11 = vsel %vm630_vm13, %v637_v18, %v639_v2  ;;  %v54_v46 = vld [vmem:[#allocation5 + $0x30] sm:$0xff] }
  0x7f   :  { %v643_v0 = vsel %vm631_vm11, %v625_v63, %v642_v16  ;;  %v459_v1 = vclz %v1540_v7  ;;  %v2119_v55 = vshrl.u32 %v555_v6, 30  ;;  %v636_v20 = vsel %vm630_vm13, %v633_v41, %v635_v43  ;;  %v46_v7 = vld [vmem:[#allocation2 + $0x30] sm:$0xff] }
  0x80   :  { %v644_v61 = vsel %vm630_vm13, %v641_v17, %v643_v0  ;;  %v2126_v31 = vmul.u32.u64.low %v645_v9, %v640_v11  ;;  %v2127_v38 = vmul.u32.u64.high %v645_v9, %v640_v11, %v2126_v31  ;;  %vm711_vm15 = vcmp.gt.s32.totalorder %v710_v54, 0 }
  0x81   :  { %v2123_v30 = vmul.u32.u64.low %v645_v9, %v644_v61  ;;  %v2124_v19 = vmul.u32.u64.high %v645_v9, %v644_v61, %v2123_v30  ;;  %v2134_v28 = vor.u32 %v259_v33, %v258_v10  ;;  %v2136_v40 = vor.u32 4788187, %v263_v3 }
  0x82   :  { %v712_v41 = vsel %vm711_vm15, %v710_v54, 0  ;;  %v2140_v43 = vsel %vm1538_vm14, 0, %v1537_v60  ;;  %v1541_v18 = vadd.s32 4294967294, %v459_v1  ;;  %v652_v53 = vmul.u32 %v645_v9, %v636_v20 }
  0x83   :  { %v557_v17 = vshll.u32 %v2119_v55, 30  ;;  %vm654_vm0 = vc.u32 %v2124_v19, %v2126_v31  ;;  %v655_v2 = vadd.s32 1, %v2127_v38  ;;  %v2808_v10 = vand.u32 2147483647, %v2063_v58 }
  0x84   :  { %v2147_v33 = vsub.f32 %v46_v7, %v54_v46  ;;  %v2151_v16 = vmul.f32 %v1768_v4, %v1768_v4  ;;  %v344_v60 = vadd.s32 %v1907_v13, %v1923_v39  ;;  %v714_v54 = vand.u32 31, %v712_v41 }
  0x85   :  { %v2159_v11 = vadd.s32 %v1955_v34, %v1953_v59  ;;  %v656_v0 = vsel %vm654_vm0, %v655_v2, %v2127_v38  ;;  %v364_v1 = vsub.s32 4294967266, %v2140_v43  ;;  %vm1542_vm1 = vcmp.lt.s32.totalorder %v1541_v18, 0 }
  0x86   :  { %v657_v20 = vadd.s32 %v656_v0, %v652_v53  ;;  %v715_v61 = vsub.s32 32, %v714_v54  ;;  %v2164_v30 = vsub.s32 %v2106_v49, %v557_v17  ;;  %v707_v13 = vand.u32 8388607, %v2808_v10 }
  0x87   :  { %v713_v39 = vshrl.u32 %v712_v41, 5  ;;  %v717_v7 = vshll.u32 %v2815_v23, %v714_v54  ;;  %v720_v34 = vshll.u32 %v2813_v25, %v714_v54  ;;  %v723_v38 = vshll.u32 %v2811_v32, %v714_v54 }
  0x88   :  { %v658_v46 = vadd.s32 536870912, %v657_v20  ;;  %v718_v59 = vshrl.u32 %v2813_v25, %v715_v61  ;;  %v721_v2 = vshrl.u32 %v2811_v32, %v715_v61  ;;  %v724_v53 = vshrl.u32 %v2809_v27, %v715_v61 }
  0x89   :  { %v726_v49 = vshll.u32 %v2809_v27, %v714_v54  ;;  %v727_v17 = vshrl.u32 %v2819_v29, %v715_v61  ;;  %v360_v0 = vsub.s32 32, %v2140_v43  ;;  %v361_v41 = vshll.u32 %v2029_v22, %v2140_v43 }
  0x8a   :  { %v2179_v56 = vshrl.u32 %v658_v46, 30  ;;  %v729_v63 = vshll.u32 %v2819_v29, %v714_v54  ;;  %v365_v47 = vadd.s32 127, %v364_v1  ;;  %v2183_v6 = vsel %vm1542_vm1, 0, %v1541_v18 }
  0x8b   :  { %v560_v8 = vsub.s32 0, %v2164_v30  ;;  %v730_v10 = vshrl.u32 %v2817_v37, %v715_v61  ;;  %v708_v27 = vor.u32 8388608, %v707_v13  ;;  %v719_v32 = vor.u32 %v718_v59, %v717_v7 }
  0x8c   :  { %v722_v25 = vor.u32 %v721_v2, %v720_v34  ;;  %v728_v3 = vor.u32 %v727_v17, %v726_v49  ;;  %v725_v9 = vor.u32 %v724_v53, %v723_v38  ;;  %vm732_vm2 = vcmp.lt.s32.totalorder %v713_v39, 1  ;;  %v47_v49 = vld [vmem:[#allocation2 + $0x38] sm:$0xff] }
  0x8d   :  { %v731_v23 = vor.u32 %v730_v10, %v729_v63  ;;  %vm735_vm3 = vcmp.lt.s32.totalorder %v713_v39, 4  ;;  %v362_v22 = vshrl.u32 %v344_v60, %v360_v0  ;;  %v660_v43 = vshll.u32 %v2179_v56, 30  ;;  %v55_v17 = vld [vmem:[#allocation5 + $0x38] sm:$0xff] }
  0x8e   :  { %v2842_v54 = vmov 683565275   ;;  %vm734_vm4 = vcmp.lt.s32.totalorder %v713_v39, 3  ;;  %v467_v18 = vsub.s32 4294967266, %v2183_v6  ;;  %v1544_v46 = vmin.u32 %v560_v8, %v2164_v30 }
  0x8f   :  { %v716_v1 = vshrl.u32 %v2842_v54, %v715_v61  ;;  %v737_v37 = vsel %vm735_vm3, %v725_v9, 2102212464  ;;  %v806_v13 = vand.u32 2139095040, %v2147_v33  ;;  %vm733_vm5 = vcmp.lt.s32.totalorder %v713_v39, 2 }
  0x90   :  { %v740_v7 = vsel %vm732_vm2, %v719_v32, %v722_v25  ;;  %v741_v63 = vsel %vm735_vm3, %v728_v3, 920167782  ;;  %v748_v10 = vshll.u32 %v708_v27, 8  ;;  %v366_v60 = vshll.u32 %v365_v47, 23 }
  0x91   :  { %v742_v59 = vsel %vm734_vm4, %v725_v9, %v741_v63  ;;  %v744_v61 = vsel %vm732_vm2, %v722_v25, %v725_v9  ;;  %v745_v34 = vsel %vm735_vm3, %v731_v23, 1326507024  ;;  %v463_v38 = vsub.s32 32, %v2183_v6 }
  0x92   :  { %v2199_v8 = vsub.s32 %v657_v20, %v660_v43  ;;  %v736_v2 = vsel %vm732_vm2, %v716_v1, %v719_v32  ;;  %v738_v53 = vsel %vm734_vm4, %v722_v25, %v737_v37  ;;  %v562_v0 = vclz %v1544_v46 }
  0x93   :  { %v743_v27 = vsel %vm733_vm5, %v740_v7, %v742_v59  ;;  %v746_v47 = vsel %vm734_vm4, %v728_v3, %v745_v34  ;;  %v807_v63 = vshrl.u32 %v806_v13, 23  ;;  %v468_v29 = vadd.s32 127, %v467_v18 }
  0x94   :  { %v747_v9 = vsel %vm733_vm5, %v744_v61, %v746_v47  ;;  %v2206_v23 = vmul.u32.u64.low %v748_v10, %v743_v27  ;;  %v2207_v14 = vmul.u32.u64.high %v748_v10, %v743_v27, %v2206_v23  ;;  %v739_v20 = vsel %vm733_vm5, %v736_v2, %v738_v53 }
  0x95   :  { %v2211_v32 = vmul.u32.u64.low %v748_v10, %v747_v9  ;;  %v2212_v43 = vmul.u32.u64.high %v748_v10, %v747_v9, %v2211_v32  ;;  %v1555_v25 = vadd.s32 4294967169, %v807_v63  ;;  %v2214_v37 = vsub.f32 %v47_v49, %v55_v17 }
  0x96   :  { %v2843_v1 = vand.u32 2147483647, %v2136_v40  ;;  %v2844_v3 = vcvt.s32.f32 %v2134_v28  ;;  %v363_v18 = vor.u32 %v362_v22, %v361_v41  ;;  %v663_v13 = vsub.s32 0, %v2199_v8 }
  0x97   :  { %v367_v7 = vor.u32 4788187, %v366_v60  ;;  %v464_v59 = vshll.u32 %v2075_v45, %v2183_v6  ;;  %v1545_v39 = vadd.s32 4294967294, %v562_v0  ;;  %v813_v61 = vadd.s32 1, %v1555_v25 }
  0x98   :  { %v268_v46 = vmul.f32 %v2844_v3, %v2843_v1  ;;  %v465_v34 = vshrl.u32 %v2159_v11, %v463_v38  ;;  %v469_v2 = vshll.u32 %v468_v29, 23  ;;  %v755_v53 = vmul.u32 %v748_v10, %v739_v20 }
  0x99   :  { %v758_v49 = vadd.s32 1, %v2207_v14  ;;  %v2227_v40 = vmul.f32 %v1770_v5, %v1770_v5  ;;  %v2231_v28 = vmul.f32 %v1774_v15, %v1774_v15  ;;  %v2235_v41 = vmul.f32 %v1846_v24, %v1846_v24 }
  0x9a   :  { %vm757_vm6 = vc.u32 %v2212_v43, %v2206_v23  ;;  %v269_v45 = vxor.u32 2147483648, %v268_v46  ;;  %v271_v29 = vsub.s32 4, %v1946_v52  ;;  %v370_v6 = vcvt.s32.f32 %v363_v18 }
  0x9b   :  { %2845 = vst [vmem:[#allocation19_spill] sm:$0xff] %v2231_v28  ;;  %v1548_v11 = vmin.u32 %v663_v13, %v2199_v8  ;;  %v368_v22 = vand.u32 2147483647, %v367_v7  ;;  %vm1546_vm7 = vcmp.lt.s32.totalorder %v1545_v39, 0  ;;  %v759_v10 = vsel %vm757_vm6, %v758_v49, %v2207_v14 }
  0x9c   :  { %vm814_vm8 = vcmp.gt.s32.totalorder %v813_v61, 0  ;;  %vm187_vm9 = vcmp.lt.s32.totalorder %v1768_v4, 0  ;;  %v2243_v60 = vor.u32 %v465_v34, %v464_v59  ;;  %v2245_v38 = vor.u32 4788187, %v469_v2 }
  0x9d   :  { %v760_v17 = vadd.s32 %v759_v10, %v755_v53  ;;  %v2249_v0 = vmul.f32 %v1998_v44, %v1998_v44  ;;  %v2822_v27 = vand.u32 2147483647, %v2147_v33  ;;  %v815_v47 = vsel %vm814_vm8, %v813_v61, 0 }
  0x9e   :  { %v909_v63 = vand.u32 2139095040, %v2214_v37  ;;  %v2255_v14 = vmul.f32 %v2063_v58, %v2063_v58  ;;  %v2257_v9 = vsel %vm1546_vm7, 0, %v1545_v39  ;;  %v665_v20 = vclz %v1548_v11 }
  0x9f   :  { %2846 = vst [vmem:[#allocation20_spill] sm:$0xff] %v2249_v0  ;;  %v761_v32 = vadd.s32 536870912, %v760_v17  ;;  %v2259_v25 = vsel %vm187_vm9, %v269_v45, %v268_v46  ;;  %v2262_v1 = vsel %vm187_vm9, %v271_v29, %v1946_v52  ;;  %v2264_v3 = vmul.f32 %v370_v6, %v368_v22 }
  0xa0   :  { %2847 = vst [vmem:[#allocation21_spill] sm:$0xff] %v2255_v14  ;;  %v817_v18 = vand.u32 31, %v815_v47  ;;  %v550_v59 = vadd.s32 %v2034_v26, %v2041_v36  ;;  %v570_v39 = vsub.s32 4294967266, %v2257_v9  ;;  %v810_v46 = vand.u32 8388607, %v2822_v27 }
  0xa1   :  { %v2270_v61 = vshrl.u32 %v761_v32, 30  ;;  %v910_v52 = vshrl.u32 %v909_v63, 23  ;;  %v1549_v2 = vadd.s32 4294967294, %v665_v20  ;;  %v816_v49 = vshrl.u32 %v815_v47, 5 }
  0xa2   :  { %v818_v34 = vsub.s32 32, %v817_v18  ;;  %v820_v45 = vshll.u32 %v2842_v54, %v817_v18  ;;  %v2848_v29 = vmov 2475754826   ;;  %v2849_v26 = vmov 2131351028  }
  0xa3   :  { %v763_v53 = vshll.u32 %v2270_v61, 30  ;;  %v823_v11 = vshll.u32 %v2848_v29, %v817_v18  ;;  %v2850_v22 = vmov 2102212464   ;;  %v826_v27 = vshll.u32 %v2849_v26, %v817_v18 }
  0xa4   :  { %v821_v6 = vshrl.u32 %v2848_v29, %v818_v34  ;;  %v824_v36 = vshrl.u32 %v2849_v26, %v818_v34  ;;  %v829_v10 = vshll.u32 %v2850_v22, %v817_v18  ;;  %v827_v63 = vshrl.u32 %v2850_v22, %v818_v34 }
  0xa5   :  { %v2281_v32 = vsub.s32 %v760_v17, %v763_v53  ;;  %v2851_v20 = vmov 920167782   ;;  %v566_v47 = vsub.s32 32, %v2257_v9  ;;  %v567_v13 = vshll.u32 %v2164_v30, %v2257_v9 }
  0xa6   :  { %v830_v7 = vshrl.u32 %v2851_v20, %v818_v34  ;;  %v571_v57 = vadd.s32 127, %v570_v39  ;;  %v1559_v48 = vadd.s32 4294967169, %v910_v52  ;;  %vm1550_vm10 = vcmp.lt.s32.totalorder %v1549_v2, 0 }
  0xa7   :  { %v766_v42 = vsub.s32 0, %v2281_v32  ;;  %v811_v62 = vor.u32 8388608, %v810_v46  ;;  %v822_v50 = vor.u32 %v821_v6, %v820_v45  ;;  %v2852_v17 = vand.u32 2147483647, %v1768_v4 }
  0xa8   :  { %v825_v35 = vor.u32 %v824_v36, %v823_v11  ;;  %v831_v12 = vor.u32 %v830_v7, %v829_v10  ;;  %v832_v0 = vshll.u32 %v2851_v20, %v817_v18  ;;  %v2855_v14 = vmov 1326507024  }
  0xa9   :  { %vm2292_vm11 = vcmp.le.f32.partialorder %v2852_v17, 0.7853982  ;;  %v833_v28 = vshrl.u32 %v2855_v14, %v818_v34  ;;  %v1552_v30 = vmin.u32 %v766_v42, %v2281_v32  ;;  %v819_v9 = vshrl.u32 %v2842_v54, %v818_v34 }
  0xaa   :  { %v828_v39 = vor.u32 %v827_v63, %v826_v27  ;;  %vm835_vm12 = vcmp.lt.s32.totalorder %v816_v49, 1  ;;  %v568_v46 = vshrl.u32 %v550_v59, %v566_v47  ;;  %vm837_vm13 = vcmp.lt.s32.totalorder %v816_v49, 3 }
  0xab   :  { %v834_v52 = vor.u32 %v833_v28, %v832_v0  ;;  %v916_v45 = vadd.s32 1, %v1559_v48  ;;  %v572_v6 = vshll.u32 %v571_v57, 23  ;;  %vm836_vm14 = vcmp.lt.s32.totalorder %v816_v49, 2 }
  0xac   :  { %vm838_vm15 = vcmp.lt.s32.totalorder %v816_v49, 4  ;;  %v851_v17 = vshll.u32 %v811_v62, 8  ;;  %v2301_v7 = vsel %vm1550_vm10, 0, %v1549_v2  ;;  %v843_v11 = vsel %vm835_vm12, %v822_v50, %v825_v35 }
  0xad   :  { %v840_v18 = vsel %vm838_vm15, %v828_v39, 2102212464  ;;  %v844_v36 = vsel %vm838_vm15, %v831_v12, 920167782  ;;  %v768_v42 = vclz %v1552_v30  ;;  %v839_v34 = vsel %vm835_vm12, %v819_v9, %v822_v50 }
  0xae   :  { %v845_v27 = vsel %vm837_vm13, %v828_v39, %v844_v36  ;;  %v847_v28 = vsel %vm835_vm12, %v825_v35, %v828_v39  ;;  %v841_v48 = vsel %vm837_vm13, %v825_v35, %v840_v18  ;;  %v848_v0 = vsel %vm838_vm15, %v834_v52, 1326507024 }
  0xaf   :  { %v846_v57 = vsel %vm836_vm14, %v843_v11, %v845_v27  ;;  %vm917_vm0 = vcmp.gt.s32.totalorder %v916_v45, 0  ;;  %v2309_v62 = vor.u32 %v568_v46, %v567_v13  ;;  %v849_v59 = vsel %vm837_vm13, %v831_v12, %v848_v0 }
  0xb0   :  { %v2312_v2 = vmul.u32.u64.low %v851_v17, %v846_v57  ;;  %v2313_v10 = vmul.u32.u64.high %v851_v17, %v846_v57, %v2312_v2  ;;  %v2316_v63 = vor.u32 4788187, %v572_v6  ;;  %v653_v50 = vadd.s32 %v2126_v31, %v2124_v19 }
  0xb1   :  { %v850_v47 = vsel %vm836_vm14, %v847_v28, %v849_v59  ;;  %v918_v35 = vsel %vm917_vm0, %v916_v45, 0  ;;  %v669_v30 = vsub.s32 32, %v2301_v7  ;;  %v673_v9 = vsub.s32 4294967266, %v2301_v7 }
  0xb2   :  { %v842_v13 = vsel %vm836_vm14, %v839_v34, %v841_v48  ;;  %v2833_v12 = vand.u32 2147483647, %v2214_v37  ;;  %v1553_v39 = vadd.s32 4294967294, %v768_v42  ;;  %v920_v6 = vand.u32 31, %v918_v35 }
  0xb3   :  { %v2325_v46 = vmul.u32.u64.low %v851_v17, %v850_v47  ;;  %v2326_v52 = vmul.u32.u64.high %v851_v17, %v850_v47, %v2325_v46  ;;  %v2330_v18 = vmul.f32 %v2147_v33, %v2147_v33  ;;  %v2336_v19 = vsel %vm2292_vm11, %v1768_v4, %v2259_v25 }
  0xb4   :  { %v274_v31 = vsel %vm2292_vm11, 0, %v2262_v1  ;;  %v861_v49 = vadd.s32 1, %v2313_v10  ;;  %v372_v45 = vxor.u32 2147483648, %v2264_v3  ;;  %v2856_v11 = vand.u32 2147483647, %v2245_v38 }
  0xb5   :  { %v2857_v36 = vcvt.s32.f32 %v2243_v60  ;;  %v858_v34 = vmul.u32 %v851_v17, %v842_v13  ;;  %v921_v27 = vsub.s32 32, %v920_v6  ;;  %v670_v48 = vshll.u32 %v2199_v8, %v2301_v7 }
  0xb6   :  { %v913_v57 = vand.u32 8388607, %v2833_v12  ;;  %v671_v0 = vshrl.u32 %v653_v50, %v669_v30  ;;  %v674_v59 = vadd.s32 127, %v673_v9  ;;  %vm1554_vm1 = vcmp.lt.s32.totalorder %v1553_v39, 0 }
  0xb7   :  { %v2347_v42 = vmul.f32 %v2857_v36, %v2856_v11  ;;  %vm860_vm2 = vc.u32 %v2326_v52, %v2312_v2  ;;  %v923_v38 = vshll.u32 %v2842_v54, %v920_v6  ;;  %v926_v17 = vshll.u32 %v2848_v29, %v920_v6 }
  0xb8   :  { %v862_v60 = vsel %vm860_vm2, %v861_v49, %v2313_v10  ;;  %v932_v47 = vshll.u32 %v2850_v22, %v920_v6  ;;  %v2361_v46 = vshrl.u32 %v918_v35, 5  ;;  %v924_v8 = vshrl.u32 %v2848_v29, %v921_v27 }
  0xb9   :  { %v863_v13 = vadd.s32 %v862_v60, %v858_v34  ;;  %v927_v7 = vshrl.u32 %v2849_v26, %v921_v27  ;;  %vm290_vm3 = vcmp.lt.s32.totalorder %v1770_v5, 0  ;;  %v2366_v50 = vsel %vm1554_vm1, 0, %v1553_v39 }
  0xba   :  { %v929_v30 = vshll.u32 %v2849_v26, %v920_v6  ;;  %v930_v10 = vshrl.u32 %v2850_v22, %v921_v27  ;;  %v933_v9 = vshrl.u32 %v2851_v20, %v921_v27  ;;  %v756_v49 = vadd.s32 %v2206_v23, %v2212_v43 }
  0xbb   :  { %v864_v11 = vadd.s32 536870912, %v863_v13  ;;  %v914_v35 = vor.u32 8388608, %v913_v57  ;;  %v935_v36 = vshll.u32 %v2851_v20, %v920_v6  ;;  %v675_v29 = vshll.u32 %v674_v59, 23 }
  0xbc   :  { %v925_v34 = vor.u32 %v924_v8, %v923_v38  ;;  %v928_v60 = vor.u32 %v927_v7, %v926_v17  ;;  %v934_v12 = vor.u32 %v933_v9, %v932_v47  ;;  %v776_v39 = vsub.s32 4294967266, %v2366_v50 }
  0xbd   :  { %v2375_v25 = vshrl.u32 %v864_v11, 30  ;;  %v936_v26 = vshrl.u32 %v2855_v14, %v921_v27  ;;  %vm938_vm4 = vcmp.lt.s32.totalorder %v2361_v46, 1  ;;  %v672_v22 = vor.u32 %v671_v0, %v670_v48 }
  0xbe   :  { %v772_v28 = vsub.s32 32, %v2366_v50  ;;  %v931_v23 = vor.u32 %v930_v10, %v929_v30  ;;  %vm941_vm5 = vcmp.lt.s32.totalorder %v2361_v46, 4  ;;  %v2858_v43 = vand.u32 2147483647, %v1770_v5 }
  0xbf   :  { %v866_v6 = vshll.u32 %v2375_v25, 30  ;;  %v922_v57 = vshrl.u32 %v2842_v54, %v921_v27  ;;  %v937_v59 = vor.u32 %v936_v26, %v935_v36  ;;  %vm940_vm7 = vcmp.lt.s32.totalorder %v2361_v46, 3 }
  0xc0   :  { %vm2383_vm6 = vcmp.le.f32.partialorder %v2858_v43, 0.7853982  ;;  %vm393_vm8 = vcmp.lt.s32.totalorder %v1774_v15, 0  ;;  %vm939_vm9 = vcmp.lt.s32.totalorder %v2361_v46, 2  ;;  %v946_v14 = vsel %vm938_vm4, %v925_v34, %v928_v60 }
  0xc1   :  { %v947_v48 = vsel %vm941_vm5, %v934_v12, 920167782  ;;  %v954_v0 = vshll.u32 %v914_v35, 8  ;;  %v676_v38 = vor.u32 4788187, %v675_v29  ;;  %v777_v17 = vadd.s32 127, %v776_v39 }
  0xc2   :  { %v2396_v47 = vsub.s32 %v863_v13, %v866_v6  ;;  %v943_v54 = vsel %vm941_vm5, %v931_v23, 2102212464  ;;  %v773_v27 = vshll.u32 %v2281_v32, %v2366_v50  ;;  %v774_v8 = vshrl.u32 %v756_v49, %v772_v28 }
  0xc3   :  { %v948_v7 = vsel %vm940_vm7, %v931_v23, %v947_v48  ;;  %v951_v30 = vsel %vm941_vm5, %v937_v59, 1326507024  ;;  %v2861_v10 = vand.u32 2147483647, %v1774_v15  ;;  %v942_v11 = vsel %vm938_vm4, %v922_v57, %v925_v34 }
  0xc4   :  { %v869_v13 = vsub.s32 0, %v2396_v47  ;;  %v949_v32 = vsel %vm939_vm9, %v946_v14, %v948_v7  ;;  %v950_v28 = vsel %vm938_vm4, %v928_v60, %v931_v23  ;;  %v944_v50 = vsel %vm940_vm7, %v928_v60, %v943_v54 }
  0xc5   :  { %vm2408_vm10 = vcmp.le.f32.partialorder %v2861_v10, 0.7853982  ;;  %v952_v49 = vsel %vm940_vm7, %v934_v12, %v951_v30  ;;  %v2423_v35 = vmul.u32.u64.low %v954_v0, %v949_v32  ;;  %v2424_v36 = vmul.u32.u64.high %v954_v0, %v949_v32, %v2423_v35 }
  0xc6   :  { %1607 = vcosq.f32 %v2336_v19  ;;  %v373_v29 = vsel %vm290_vm3, %v372_v45, %v2264_v3  ;;  %vm496_vm12 = vcmp.lt.s32.totalorder %v1846_v24, 0  ;;  %v778_v34 = vshll.u32 %v777_v17, 23 }
  0xc7   :  { %v1556_v60 = vmin.u32 %v869_v13, %v2396_v47  ;;  %v475_v39 = vxor.u32 2147483648, %v2347_v42  ;;  %v677_v12 = vand.u32 2147483647, %v676_v38  ;;  %v679_v26 = vcvt.s32.f32 %v672_v22 }
  0xc8   :  { %v953_v23 = vsel %vm939_vm9, %v950_v28, %v952_v49  ;;  %v945_v6 = vsel %vm939_vm9, %v942_v11, %v944_v50  ;;  %v2447_v3 = vand.u32 3, %v274_v31  ;;  %v2864_v45 = vand.u32 2147483647, %v1846_v24 }
  0xc9   :  { %v871_v43 = vclz %v1556_v60  ;;  %v2440_v57 = vmul.u32.u64.low %v954_v0, %v953_v23  ;;  %v2441_v59 = vmul.u32.u64.high %v954_v0, %v953_v23, %v2440_v57  ;;  %v2867_v14 = vand.u32 2147483647, %v2316_v63 }
  0xca   :  { %vm2451_vm13 = vcmp.le.f32.partialorder %v2864_v45, 0.7853982  ;;  %v2868_v46 = vcvt.s32.f32 %v2309_v62  ;;  %v775_v38 = vor.u32 %v774_v8, %v773_v27  ;;  %v964_v17 = vadd.s32 1, %v2424_v36 }
  0xcb   :  { %1609 = vsinq.f32 %v2336_v19  ;;  %v374_v1 = vsub.s32 4, %v2000_v51  ;;  %v779_v53 = vor.u32 4788187, %v778_v34  ;;  %v1557_v31 = vadd.s32 4294967294, %v871_v43 }
  0xcc   :  { %v577_v48 = vmul.f32 %v2868_v46, %v2867_v14  ;;  %v376_v54 = vsel %vm2383_vm6, %v1770_v5, %v373_v29  ;;  %v477_v7 = vsub.s32 4, %v2031_v21  ;;  %v680_v30 = vmul.f32 %v679_v26, %v677_v12 }
  0xcd   :  { %v961_v63 = vmul.u32 %v954_v0, %v945_v6  ;;  %v476_v62 = vsel %vm393_vm8, %v475_v39, %v2347_v42  ;;  %v859_v27 = vadd.s32 %v2312_v2, %v2326_v52  ;;  %vm1558_vm11 = vcmp.lt.s32.totalorder %v1557_v31, 0 }
  0xce   :  { %vm963_vm14 = vc.u32 %v2441_v59, %v2423_v35  ;;  %v578_v19 = vxor.u32 2147483648, %v577_v48  ;;  %v782_v8 = vcvt.s32.f32 %v775_v38  ;;  %v874_v10 = vsel %vm1558_vm11, 0, %v1557_v31 }
  0xcf   :  { %v965_v13 = vsel %vm963_vm14, %v964_v17, %v2424_v36  ;;  %v780_v11 = vand.u32 2147483647, %v779_v53  ;;  %v875_v32 = vsub.s32 32, %v874_v10  ;;  %v876_v0 = vshll.u32 %v2396_v47, %v874_v10 }
  0xd0   :  { %v879_v28 = vsub.s32 4294967266, %v874_v10  ;;  %1611 = vcosq.f32 %v376_v54  ;;  %v479_v42 = vsel %vm2408_vm10, %v1774_v15, %v476_v62  ;;  %v681_v2 = vxor.u32 2147483648, %v680_v30  ;;  %v1608_v50 = vpop.eup %1607 }
  0xd1   :  { %v966_v52 = vadd.s32 %v965_v13, %v961_v63  ;;  %vm280_vm15 = vcmp.eq.s32.totalorder %v2447_v3, 0  ;;  %v375_v49 = vsel %vm290_vm3, %v374_v1, %v2000_v51  ;;  %vm599_vm0 = vcmp.lt.s32.totalorder %v1998_v44, 0 }
  0xd2   :  { %v877_v36 = vshrl.u32 %v859_v27, %v875_v32  ;;  %v880_v29 = vadd.s32 127, %v879_v28  ;;  %1613 = vsinq.f32 %v376_v54  ;;  %v579_v47 = vsel %vm496_vm12, %v578_v19, %v577_v48 }
  0xd3   :  { %v2869_v34 = vand.u32 2147483647, %v1998_v44  ;;  %v967_v39 = vadd.s32 536870912, %v966_v52  ;;  %1615 = vcosq.f32 %v479_v42  ;;  %v783_v12 = vmul.f32 %v782_v8, %v780_v11 }
  0xd4   :  { %v878_v26 = vor.u32 %v877_v36, %v876_v0  ;;  %v881_v23 = vshll.u32 %v880_v29, 23  ;;  %vm279_vm2 = vcmp.lt.s32.totalorder %v2447_v3, 2  ;;  %v478_v51 = vsel %vm393_vm8, %v477_v7, %v2031_v21 }
  0xd5   :  { %vm2487_vm1 = vcmp.le.f32.partialorder %v2869_v34, 0.7853982  ;;  %1617 = vsinq.f32 %v479_v42  ;;  %v682_v43 = vsel %vm599_vm0, %v681_v2, %v680_v30  ;;  %v2497_v6 = vshrl.u32 %v967_v39, 30  ;;  %v1610_v57 = vpop.eup %1609 }
  0xd6   :  { %v580_v45 = vsub.s32 4, %v2119_v55  ;;  %v582_v14 = vsel %vm2451_vm13, %v1846_v24, %v579_v47  ;;  %v882_v46 = vor.u32 4788187, %v881_v23  ;;  %v885_v48 = vcvt.s32.f32 %v878_v26 }
  0xd7   :  { %vm283_vm3 = vcmp.eq.s32.totalorder %v2447_v3, 2  ;;  %v284_v38 = vxor.u32 2147483648, %v1608_v50  ;;  %v377_v21 = vsel %vm2383_vm6, 0, %v375_v49  ;;  %v969_v17 = vshll.u32 %v2497_v6, 30 }
  0xd8   :  { %v480_v1 = vsel %vm2408_vm10, 0, %v478_v51  ;;  %v685_v53 = vsel %vm2487_vm1, %v1998_v44, %v682_v43  ;;  %v784_v31 = vxor.u32 2147483648, %v783_v12  ;;  %v883_v54 = vand.u32 2147483647, %v882_v46 }
  0xd9   :  { %v281_v7 = vxor.u32 2147483648, %v1610_v57  ;;  %1619 = vcosq.f32 %v582_v14  ;;  %vm702_vm4 = vcmp.lt.s32.totalorder %v2063_v58, 0  ;;  %v2513_v30 = vsub.s32 %v966_v52, %v969_v17 }
  0xda   :  { %v2515_v63 = vand.u32 3, %v377_v21  ;;  %v581_v20 = vsel %vm496_vm12, %v580_v45, %v2119_v55  ;;  %1621 = vsinq.f32 %v582_v14  ;;  %v886_v9 = vmul.f32 %v885_v48, %v883_v54  ;;  %v1612_v62 = vpop.eup %1611 }
  0xdb   :  { %v285_v27 = vsel %vm283_vm3, %v284_v38, %v1610_v57  ;;  %v2522_v19 = vand.u32 3, %v480_v1  ;;  %1623 = vcosq.f32 %v685_v53  ;;  %v972_v8 = vsub.s32 0, %v2513_v30 }
  0xdc   :  { %v683_v10 = vsub.s32 4, %v2179_v56  ;;  %1625 = vsinq.f32 %v685_v53  ;;  %v2872_v13 = vand.u32 2147483647, %v2063_v58  ;;  %v785_v55 = vsel %vm702_vm4, %v784_v31, %v783_v12  ;;  %v1614_v32 = vpop.eup %1613 }
  0xdd   :  { %v282_v0 = vsel %vm280_vm15, %v1608_v50, %v281_v7  ;;  %v583_v28 = vsel %vm2451_vm13, 0, %v581_v20  ;;  %v887_v42 = vxor.u32 2147483648, %v886_v9  ;;  %v1560_v2 = vmin.u32 %v972_v8, %v2513_v30  ;;  %v1616_v52 = vpop.eup %1615 }
  0xde   :  { %vm2528_vm5 = vcmp.le.f32.partialorder %v2872_v13, 0.7853982  ;;  %vm383_vm6 = vcmp.eq.s32.totalorder %v2515_v63, 0  ;;  %vm386_vm7 = vcmp.eq.s32.totalorder %v2515_v63, 2  ;;  %v387_v49 = vxor.u32 2147483648, %v1612_v62 }
  0xdf   :  { %vm805_vm8 = vcmp.lt.s32.totalorder %v2147_v33, 0  ;;  %v1618_v36 = vpop.eup %1617  ;;  %vm382_vm9 = vcmp.lt.s32.totalorder %v2515_v63, 2  ;;  %vm486_vm10 = vcmp.eq.s32.totalorder %v2522_v19, 0  ;;  %vm489_vm12 = vcmp.eq.s32.totalorder %v2522_v19, 2 }
  0xe0   :  { %v788_v22 = vsel %vm2528_vm5, %v2063_v58, %v785_v55  ;;  %v974_v50 = vclz %v1560_v2  ;;  %v2550_v29 = vsel %vm279_vm2, %v282_v0, %v285_v27  ;;  %v384_v47 = vxor.u32 2147483648, %v1614_v32 }
  0xe1   :  { %vm485_vm13 = vcmp.lt.s32.totalorder %v2522_v19, 2  ;;  %v2553_v34 = vand.u32 3, %v583_v28  ;;  %v684_v39 = vsel %vm599_vm0, %v683_v10, %v2179_v56  ;;  %v786_v12 = vsub.s32 4, %v2270_v61 }
  0xe2   :  { %v2875_v26 = vand.u32 2147483647, %v2147_v33  ;;  %v888_v3 = vsel %vm805_vm8, %v887_v42, %v886_v9  ;;  %v1561_v51 = vadd.s32 4294967294, %v974_v50  ;;  %v388_v43 = vsel %vm386_vm7, %v387_v49, %v1614_v32 }
  0xe3   :  { %v487_v57 = vxor.u32 2147483648, %v1618_v36  ;;  %v490_v45 = vxor.u32 2147483648, %v1616_v52  ;;  %1627 = vcosq.f32 %v788_v22  ;;  %v1620_v14 = vpop.eup %1619  ;;  %vm277_vm14 = vweird.f32 %v1768_v4 }
  0xe4   :  { %vm2561_vm11 = vcmp.le.f32.partialorder %v2875_v26, 0.7853982  ;;  %vm380_vm15 = vweird.f32 %v1770_v5  ;;  %vm483_vm0 = vweird.f32 %v1774_v15  ;;  %v686_v56 = vsel %vm2487_vm1, 0, %v684_v39  ;;  %v1622_v48 = vpop.eup %1621 }
  0xe5   :  { %1629 = vsinq.f32 %v788_v22  ;;  %v962_v46 = vadd.s32 %v2423_v35, %v2441_v59  ;;  %vm1562_vm2 = vcmp.lt.s32.totalorder %v1561_v51, 0  ;;  %v385_v38 = vsel %vm383_vm6, %v1612_v62, %v384_v47  ;;  %v1624_v1 = vpop.eup %1623 }
  0xe6   :  { %vm589_vm3 = vcmp.eq.s32.totalorder %v2553_v34, 0  ;;  %v891_v21 = vsel %vm2561_vm11, %v2147_v33, %v888_v3  ;;  %v977_v17 = vsel %vm1562_vm2, 0, %v1561_v51  ;;  %v787_v60 = vsel %vm702_vm4, %v786_v12, %v2270_v61  ;;  %v1626_v31 = vpop.eup %1625 }
  0xe7   :  { %v978_v53 = vsub.s32 32, %v977_v17  ;;  %v979_v35 = vshll.u32 %v2513_v30, %v977_v17  ;;  %v982_v59 = vsub.s32 4294967266, %v977_v17  ;;  %v491_v54 = vsel %vm489_vm12, %v490_v45, %v1618_v36 }
  0xe8   :  { %vm592_vm1 = vcmp.eq.s32.totalorder %v2553_v34, 2  ;;  %v690_v7 = vand.u32 3, %v686_v56  ;;  %v889_v20 = vsub.s32 4, %v2375_v25  ;;  %v488_v9 = vsel %vm486_vm10, %v1616_v52, %v487_v57 }
  0xe9   :  { %vm586_vm6 = vweird.f32 %v1846_v24  ;;  %1631 = vcosq.f32 %v891_v21  ;;  %v980_v61 = vshrl.u32 %v962_v46, %v978_v53  ;;  %v983_v62 = vadd.s32 127, %v982_v59 }
  0xea   :  { %v590_v27 = vxor.u32 2147483648, %v1622_v48  ;;  %v593_v30 = vxor.u32 2147483648, %v1620_v14  ;;  %vm689_vm4 = vweird.f32 %v1998_v44  ;;  %v789_v8 = vsel %vm2528_vm5, 0, %v787_v60 }
  0xeb   :  { %1633 = vsinq.f32 %v891_v21  ;;  %v693_v10 = vxor.u32 2147483648, %v1626_v31  ;;  %v696_v13 = vxor.u32 2147483648, %v1624_v1  ;;  %v981_v55 = vor.u32 %v980_v61, %v979_v35 }
  0xec   :  { %v984_v32 = vshll.u32 %v983_v62, 23  ;;  %v389_v0 = vsel %vm382_vm9, %v385_v38, %v388_v43  ;;  %vm692_vm7 = vcmp.eq.s32.totalorder %v690_v7, 0  ;;  %vm695_vm10 = vcmp.eq.s32.totalorder %v690_v7, 2 }
  0xed   :  { %v890_v28 = vsel %vm805_vm8, %v889_v20, %v2375_v25  ;;  %v492_v42 = vsel %vm485_vm13, %v488_v9, %v491_v54  ;;  %vm588_vm12 = vcmp.lt.s32.totalorder %v2553_v34, 2  ;;  %v988_v2 = vcvt.s32.f32 %v981_v55  ;;  %v1628_v52 = vpop.eup %1627 }
  0xee   :  { %v985_v11 = vor.u32 4788187, %v984_v32  ;;  %v591_v49 = vsel %vm589_vm3, %v1620_v14, %v590_v27  ;;  %v594_v63 = vsel %vm592_vm1, %v593_v30, %v1622_v48  ;;  %vm691_vm5 = vcmp.lt.s32.totalorder %v690_v7, 2 }
  0xef   :  { %v793_v36 = vand.u32 3, %v789_v8  ;;  %v1630_v22 = vpop.eup %1629  ;;  %v694_v50 = vsel %vm692_vm7, %v1624_v1, %v693_v10  ;;  %v697_v47 = vsel %vm695_vm10, %v696_v13, %v1626_v31  ;;  %v892_v25 = vsel %vm2561_vm11, 0, %v890_v28 }
  0xf0   :  { %v986_v19 = vand.u32 2147483647, %v985_v11  ;;  %v287_v39 = vsel %vm277_vm14, nan, %v2550_v29  ;;  %v390_v12 = vsel %vm380_vm15, nan, %v389_v0  ;;  %v493_v26 = vsel %vm483_vm0, nan, %v492_v42 }
  0xf1   :  { %vm908_vm8 = vcmp.lt.s32.totalorder %v2214_v37, 0  ;;  %v595_v3 = vsel %vm588_vm12, %v591_v49, %v594_v63  ;;  %v2878_v51 = vand.u32 2147483647, %v2214_v37  ;;  %v698_v4 = vsel %vm691_vm5, %v694_v50, %v697_v47  ;;  %v2884_v50 = vld [vmem:[#allocation20_spill] sm:$0xff] }
  0xf2   :  { %v989_v43 = vmul.f32 %v988_v2, %v986_v19  ;;  %v796_v29 = vxor.u32 2147483648, %v1630_v22  ;;  %v799_v57 = vxor.u32 2147483648, %v1628_v52  ;;  %v896_v5 = vand.u32 3, %v892_v25  ;;  %v2882_v2 = vld [vmem:[#allocation19_spill] sm:$0xff] }
  0xf3   :  { %vm2622_vm9 = vcmp.le.f32.partialorder %v2878_v51, 0.7853982  ;;  %v1632_v45 = vpop.eup %1631  ;;  %vm795_vm13 = vcmp.eq.s32.totalorder %v793_v36, 0  ;;  %vm798_vm11 = vcmp.eq.s32.totalorder %v793_v36, 2  ;;  %v992_v14 = vsub.s32 4, %v2497_v6 }
  0xf4   :  { %v990_v15 = vxor.u32 2147483648, %v989_v43  ;;  %v596_v34 = vsel %vm586_vm6, nan, %v595_v3  ;;  %v1009_v46 = vmul.f32 2.0, %v287_v39  ;;  %v1010_v48 = vmul.f32 2.0, %v390_v12 }
  0xf5   :  { %v1634_v56 = vpop.eup %1633  ;;  %v1721_v38 = vmov 1966171168   ;;  %v699_v17 = vsel %vm689_vm4, nan, %v698_v4  ;;  %vm794_vm14 = vcmp.lt.s32.totalorder %v793_v36, 2  ;;  %v1011_v60 = vmul.f32 2.0, %v493_v26 }
  0xf6   :  { %v1058_v21 = vunpack.c.l.s4 %v1721_v38  ;;  %v991_v1 = vsel %vm908_vm8, %v990_v15, %v989_v43  ;;  %v797_v53 = vsel %vm795_vm13, %v1628_v52, %v796_v29  ;;  %v800_v35 = vsel %vm798_vm11, %v799_v57, %v1630_v22  ;;  %v2883_v22 = vld [vmem:[#allocation21_spill] sm:$0xff] }
  0xf7   :  { %vm898_vm15 = vcmp.eq.s32.totalorder %v896_v5, 0  ;;  %v994_v24 = vsel %vm2622_vm9, %v2214_v37, %v991_v1  ;;  %v899_v59 = vxor.u32 2147483648, %v1634_v56  ;;  %v902_v31 = vxor.u32 2147483648, %v1632_v45 }
  0xf8   :  { %v993_v54 = vsel %vm908_vm8, %v992_v14, %v2497_v6  ;;  %1635 = vcosq.f32 %v994_v24  ;;  %vm901_vm0 = vcmp.eq.s32.totalorder %v896_v5, 2  ;;  %v1059_v44 = vunpack.c.0.s8 %v1058_v21 }
  0xf9   :  { %1637 = vsinq.f32 %v994_v24  ;;  %v2881_v7 = vlaneseq  ;;  %v184_v9 = vmul.f32 %v2214_v37, %v2214_v37  ;;  %vm792_vm2 = vweird.f32 %v2063_v58 }
  0xfa   :  { %vm895_vm3 = vweird.f32 %v2147_v33  ;;  %vm897_vm1 = vcmp.lt.s32.totalorder %v896_v5, 2  ;;  %v801_v61 = vsel %vm794_vm14, %v797_v53, %v800_v35  ;;  %v995_v62 = vsel %vm2622_vm9, 0, %v993_v54 }
  0xfb   :  { %v1061_v20 = vshrl.u32 %v2881_v7, 7  ;;  %v1012_v6 = vmul.f32 2.0, %v596_v34  ;;  %v1013_v27 = vmul.f32 2.0, %v699_v17  ;;  %v900_v30 = vsel %vm898_vm15, %v1632_v45, %v899_v59 }
  0xfc   :  { %v903_v8 = vsel %vm901_vm0, %v902_v31, %v1634_v56  ;;  %v1017_v10 = vsub.f32 2.0, %v1009_v46  ;;  %v1018_v13 = vsub.f32 2.0, %v1010_v48  ;;  %vm998_vm6 = vweird.f32 %v2214_v37 }
  0xfd   :  { %v1019_v55 = vsub.f32 2.0, %v1011_v60  ;;  %v1049_v32 = vcombine.low %v2151_v16, %v2227_v40  ;;  %v1050_v0 = vcombine.high %v2151_v16, %v2227_v40  ;;  %v2653_v28 = vsub.s32 %v1059_v44, %v1061_v20 }
  0xfe   :  { %v802_v42 = vsel %vm792_vm2, nan, %v801_v61  ;;  %v999_v11 = vand.u32 3, %v995_v62  ;;  %v1051_v52 = vcombine.low %v2882_v2, %v2235_v41  ;;  %v1052_v49 = vcombine.high %v2882_v2, %v2235_v41 }
  0xff   :  { %v904_v63 = vsel %vm897_vm1, %v900_v30, %v903_v8  ;;  %v1020_v36 = vsub.f32 2.0, %v1012_v6  ;;  %v1053_v47 = vcombine.low %v2884_v50, %v2883_v22  ;;  %v1055_v16 = vcombine.low %v2330_v18, %v184_v9  ;;  %v2885_v8 = vld [vmem:[#allocation11_spill] sm:$0xff] }
 0x100   :  { %v1021_v40 = vsub.f32 2.0, %v1013_v27  ;;  %v1054_v58 = vcombine.high %v2884_v50, %v2883_v22  ;;  %v1056_v25 = vcombine.high %v2330_v18, %v184_v9  ;;  %v1201_v19 = vcombine.low %v1017_v10, %v1018_v13 }
 0x101   :  { %v1014_v39 = vmul.f32 2.0, %v802_v42  ;;  %v1063_v12 = vrot.slane %v1049_v32, %v2653_v28  ;;  %v1070_v41 = vrot.slane %v1050_v0, %v2653_v28  ;;  %v1202_v26 = vcombine.high %v1017_v10, %v1018_v13  ;;  %v2893_v42 = vld [vmem:[#allocation15_spill] sm:$0xff] }
 0x102   :  { %v1636_v3 = vpop.eup %1635  ;;  %v905_v51 = vsel %vm895_vm3, nan, %v904_v63  ;;  %vm1004_vm4 = vcmp.eq.s32.totalorder %v999_v11, 2  ;;  %v1077_v23 = vrot.slane %v1051_v52, %v2653_v28  ;;  %v1084_v43 = vrot.slane %v1052_v49, %v2653_v28  ;;  %v2897_v52 = vld [vmem:[#allocation17_spill] sm:$0xff] }
 0x103   :  { %v1638_v4 = vpop.eup %1637  ;;  %vm1001_vm7 = vcmp.eq.s32.totalorder %v999_v11, 0  ;;  %v1005_v29 = vxor.u32 2147483648, %v1636_v3  ;;  %v1091_v18 = vrot.slane %v1053_v47, %v2653_v28  ;;  %v1105_v57 = vrot.slane %v1055_v16, %v2653_v28  ;;  %v2901_v16 = vld [vmem:[#allocation12_spill] sm:$0xff] }
 0x104   :  { %vm1000_vm10 = vcmp.lt.s32.totalorder %v999_v11, 2  ;;  %v1002_v5 = vxor.u32 2147483648, %v1638_v4  ;;  %v1203_v45 = vcombine.low %v1019_v55, %v1020_v36  ;;  %v1204_v15 = vcombine.high %v1019_v55, %v1020_v36  ;;  %v2889_v55 = vld [vmem:[#allocation13_spill] sm:$0xff] }
 0x105   :  { %v1006_v14 = vsel %vm1004_vm4, %v1005_v29, %v1638_v4  ;;  %v1015_v56 = vmul.f32 2.0, %v905_v51  ;;  %v1022_v33 = vsub.f32 2.0, %v1014_v39  ;;  %v1098_v34 = vrot.slane %v1054_v58, %v2653_v28 }
 0x106   :  { %v1003_v46 = vsel %vm1001_vm7, %v1636_v3, %v1002_v5  ;;  %v1112_v48 = vrot.slane %v1056_v25, %v2653_v28  ;;  %v1113_v38 = vcombine.low %v1063_v12, %v1077_v23  ;;  %v1114_v21 = vcombine.high %v1063_v12, %v1077_v23  ;;  %v2905_v25 = vld [vmem:[#allocation14_spill] sm:$0xff]  ;;  %v2909_v12 = vld [vmem:[#allocation16_spill] sm:$0xff] }
 0x107   :  { %v1007_v17 = vsel %vm1000_vm10, %v1003_v46, %v1006_v14  ;;  %v1115_v1 = vcombine.low %v1070_v41, %v1084_v43  ;;  %v1117_v60 = vcombine.low %v1091_v18, %v1105_v57  ;;  %v1215_v53 = vrot.slane %v1201_v19, %v2653_v28  ;;  %v2913_v3 = vld [vmem:[#allocation18_spill] sm:$0xff] }
 0x108   :  { %v1008_v35 = vsel %vm998_vm6, nan, %v1007_v17  ;;  %v1222_v24 = vrot.slane %v1202_v26, %v2653_v28  ;;  %v1229_v59 = vrot.slane %v1203_v45, %v2653_v28  ;;  %v1236_v31 = vrot.slane %v1204_v15, %v2653_v28 }
 0x109   :  { %v1016_v54 = vmul.f32 2.0, %v1008_v35  ;;  %v1023_v44 = vsub.f32 2.0, %v1015_v56  ;;  %v1205_v7 = vcombine.low %v1021_v40, %v1022_v33  ;;  %v1206_v20 = vcombine.high %v1021_v40, %v1022_v33 }
 0x10a   :  { %v1116_v9 = vcombine.high %v1070_v41, %v1084_v43  ;;  %v1118_v61 = vcombine.high %v1091_v18, %v1105_v57  ;;  %v1119_v62 = vcombine.low %v1098_v34, %v1112_v48  ;;  %v1120_v27 = vcombine.high %v1098_v34, %v1112_v48 }
 0x10b   :  { %v1024_v6 = vsub.f32 2.0, %v1016_v54  ;;  %v1127_v30 = vrot.slane %v1113_v38, %v2653_v28  ;;  %v1134_v37 = vrot.slane %v1115_v1, %v2653_v28  ;;  %v2886_v10 = vand.u32 3, %v2885_v8 }
 0x10c   :  { %v2890_v32 = vand.u32 3, %v2889_v55  ;;  %v2894_v11 = vand.u32 3, %v2893_v42  ;;  %v2898_v49 = vand.u32 3, %v2897_v52  ;;  %v1141_v36 = vrot.slane %v1114_v21, %v2653_v28 }
 0x10d   :  { %vm2688_vm12 = vcmp.ne.s32.totalorder %v2886_v10, 2  ;;  %v1155_v22 = vrot.slane %v1117_v60, %v2653_v28  ;;  %v1265_v50 = vcombine.low %v1215_v53, %v1229_v59  ;;  %v1267_v47 = vcombine.low %v1222_v24, %v1236_v31 }
 0x10e   :  { %vm2694_vm5 = vcmp.ne.s32.totalorder %v2890_v32, 2  ;;  %vm2700_vm8 = vcmp.ne.s32.totalorder %v2894_v11, 2  ;;  %vm2706_vm9 = vcmp.ne.s32.totalorder %v2898_v49, 2  ;;  %v2902_v40 = vand.u32 3, %v2901_v16 }
 0x10f   :  { %v2906_v19 = vand.u32 3, %v2905_v25  ;;  %v2910_v41 = vand.u32 3, %v2909_v12  ;;  %v2914_v51 = vand.u32 3, %v2913_v3  ;;  %v1207_v43 = vcombine.low %v1023_v44, %v1024_v6 }
 0x110   :  { %vm2714_vm13 = vcmp.ne.s32.totalorder %v2902_v40, 2  ;;  %v1208_v4 = vcombine.high %v1023_v44, %v1024_v6  ;;  %v1243_v29 = vrot.slane %v1205_v7, %v2653_v28  ;;  %v1250_v18 = vrot.slane %v1206_v20, %v2653_v28 }
 0x111   :  { %vm2720_vm11 = vcmp.ne.s32.totalorder %v2906_v19, 2  ;;  %vm2726_vm14 = vcmp.ne.s32.totalorder %v2910_v41, 2  ;;  %vm2732_vm15 = vcmp.ne.s32.totalorder %v2914_v51, 2  ;;  %v1148_v57 = vrot.slane %v1116_v9, %v2653_v28 }
 0x112   :  { %v1162_v5 = vrot.slane %v1119_v62, %v2653_v28  ;;  %v1266_v45 = vcombine.high %v1215_v53, %v1229_v59  ;;  %v1268_v15 = vcombine.high %v1222_v24, %v1236_v31  ;;  %v1169_v14 = vrot.slane %v1118_v61, %v2653_v28 }
 0x113   :  { %v1176_v56 = vrot.slane %v1120_v27, %v2653_v28  ;;  %v1257_v33 = vrot.slane %v1207_v43, %v2653_v28  ;;  %v1264_v34 = vrot.slane %v1208_v4, %v2653_v28  ;;  %v1177_v46 = vcombine.low %v1127_v30, %v1155_v22 }
 0x114   :  { %v1178_v48 = vcombine.high %v1127_v30, %v1155_v22  ;;  %v1279_v38 = vrot.slane %v1265_v50, %v2653_v28  ;;  %v1286_v21 = vrot.slane %v1267_v47, %v2653_v28  ;;  %v1179_v53 = vcombine.low %v1134_v37, %v1162_v5 }
 0x115   :  { %v1269_v17 = vcombine.low %v1243_v29, %v1257_v33  ;;  %v1270_v1 = vcombine.high %v1243_v29, %v1257_v33  ;;  %v1271_v60 = vcombine.low %v1250_v18, %v1264_v34  ;;  %v1272_v35 = vcombine.high %v1250_v18, %v1264_v34 }
 0x116   :  { %v1180_v24 = vcombine.high %v1134_v37, %v1162_v5  ;;  %v1293_v59 = vrot.slane %v1266_v45, %v2653_v28  ;;  %v1300_v31 = vrot.slane %v1268_v15, %v2653_v28  ;;  %v1181_v9 = vcombine.low %v1141_v36, %v1169_v14 }
 0x117   :  { %v1307_v54 = vrot.slane %v1269_v17, %v2653_v28  ;;  %v1314_v44 = vrot.slane %v1271_v60, %v2653_v28  ;;  %v1321_v7 = vrot.slane %v1270_v1, %v2653_v28  ;;  %v1328_v20 = vrot.slane %v1272_v35, %v2653_v28 }
 0x118   :  { %v1182_v61 = vcombine.high %v1141_v36, %v1169_v14  ;;  %v1183_v62 = vcombine.low %v1148_v57, %v1176_v56  ;;  %v1184_v6 = vcombine.high %v1148_v57, %v1176_v56 }
 0x119   :  { %v1329_v27 = vcombine.low %v1279_v38, %v1307_v54  ;;  %v1330_v30 = vcombine.high %v1279_v38, %v1307_v54  ;;  %v1331_v8 = vcombine.low %v1286_v21, %v1314_v44  ;;  %v1332_v37 = vcombine.high %v1286_v21, %v1314_v44 }
 0x11a   :  { %v1333_v10 = vcombine.low %v1293_v59, %v1321_v7  ;;  %v1334_v55 = vcombine.high %v1293_v59, %v1321_v7  ;;  %v1335_v32 = vcombine.low %v1300_v31, %v1328_v20  ;;  %v1336_v42 = vcombine.high %v1300_v31, %v1328_v20 }
 0x11b   :  { %v1345_v11 = vsel %vm2688_vm12, %v1177_v46, %v1329_v27  ;;  %v1347_v52 = vsel %vm2694_vm5, %v1178_v48, %v1330_v30  ;;  %v1349_v49 = vsel %vm2700_vm8, %v1179_v53, %v1331_v8  ;;  %v1351_v36 = vsel %vm2706_vm9, %v1180_v24, %v1332_v37 }
 0x11c   :  { %v1346_v22 = vsel %vm2714_vm13, %v1181_v9, %v1333_v10  ;;  %v1348_v50 = vsel %vm2720_vm11, %v1182_v61, %v1334_v55  ;;  %v1350_v47 = vsel %vm2726_vm14, %v1183_v62, %v1335_v32  ;;  %v1352_v13 = vsel %vm2732_vm15, %v1184_v6, %v1336_v42 }
 0x11d   :  { %v1361_v0 = vcombine.low %v1345_v11, %v1346_v22  ;;  %v1362_v16 = vcombine.high %v1345_v11, %v1346_v22  ;;  %v1363_v40 = vcombine.low %v1347_v52, %v1348_v50  ;;  %v1364_v2 = vcombine.high %v1347_v52, %v1348_v50 }
 0x11e   :  { %v1365_v25 = vcombine.low %v1349_v49, %v1350_v47  ;;  %v1366_v19 = vcombine.high %v1349_v49, %v1350_v47  ;;  %v1367_v63 = vcombine.low %v1351_v36, %v1352_v13  ;;  %v1368_v12 = vcombine.high %v1351_v36, %v1352_v13 }
 0x11f   :  { %v1375_v58 = vrot.slane %v1361_v0, %v2653_v28  ;;  %v1382_v41 = vrot.slane %v1362_v16, %v2653_v28  ;;  %v1389_v39 = vrot.slane %v1363_v40, %v2653_v28  ;;  %v1396_v26 = vrot.slane %v1364_v2, %v2653_v28 }
 0x120   :  { %v1403_v3 = vrot.slane %v1365_v25, %v2653_v28  ;;  %v1410_v51 = vrot.slane %v1366_v19, %v2653_v28  ;;  %v1417_v23 = vrot.slane %v1367_v63, %v2653_v28  ;;  %v1424_v43 = vrot.slane %v1368_v12, %v2653_v28 }
 0x121   :  { %v1425_v4 = vcombine.low %v1375_v58, %v1389_v39  ;;  %v1426_v29 = vcombine.high %v1375_v58, %v1389_v39  ;;  %v1427_v18 = vcombine.low %v1382_v41, %v1396_v26  ;;  %v1428_v57 = vcombine.high %v1382_v41, %v1396_v26 }
 0x122   :  { %v1429_v5 = vcombine.low %v1403_v3, %v1417_v23  ;;  %v1430_v45 = vcombine.high %v1403_v3, %v1417_v23  ;;  %v1431_v15 = vcombine.low %v1410_v51, %v1424_v43  ;;  %v1432_v14 = vcombine.high %v1410_v51, %v1424_v43 }
 0x123   :  { %v1439_v56 = vrot.slane %v1425_v4, %v2653_v28  ;;  %v1446_v33 = vrot.slane %v1427_v18, %v2653_v28  ;;  %v1453_v34 = vrot.slane %v1426_v29, %v2653_v28  ;;  %v1460_v46 = vrot.slane %v1428_v57, %v2653_v28 }
 0x124   :  { %v1467_v48 = vrot.slane %v1429_v5, %v2653_v28  ;;  %v1474_v38 = vrot.slane %v1431_v15, %v2653_v28  ;;  %v1481_v21 = vrot.slane %v1430_v45, %v2653_v28  ;;  %v1488_v17 = vrot.slane %v1432_v14, %v2653_v28 }
 0x126   :  { %v1489_v1 = vcombine.low %v1439_v56, %v1467_v48  ;;  %v1490_v60 = vcombine.high %v1439_v56, %v1467_v48  ;;  %v1491_v35 = vcombine.low %v1446_v33, %v1474_v38  ;;  %v1492_v53 = vcombine.high %v1446_v33, %v1474_v38 }
 0x127   :  { %v1493_v24 = vcombine.low %v1453_v34, %v1481_v21  ;;  %v1494_v59 = vcombine.high %v1453_v34, %v1481_v21  ;;  %v1495_v31 = vcombine.low %v1460_v46, %v1488_v17  ;;  %v1496_v54 = vcombine.high %v1460_v46, %v1488_v17 }
 0x128   :  { %1505 = vst [vmem:[#allocation7] sm:$0xff] %v1489_v1  ;;  %1507 = vst [vmem:[#allocation7 + $0x10] sm:$0xff] %v1490_v60 }
 0x129   :  { %1509 = vst [vmem:[#allocation7 + $0x20] sm:$0xff] %v1491_v35  ;;  %1511 = vst [vmem:[#allocation7 + $0x30] sm:$0xff] %v1492_v53 }
 0x12a   :  { %1506 = vst [vmem:[#allocation7 + $0x8] sm:$0xff] %v1493_v24  ;;  %1508 = vst [vmem:[#allocation7 + $0x18] sm:$0xff] %v1494_v59 }
 0x12b   :  { %1510 = vst [vmem:[#allocation7 + $0x28] sm:$0xff] %v1495_v31  ;;  %1512 = vst [vmem:[#allocation7 + $0x38] sm:$0xff] %v1496_v54 }
 0x12c   :  { %1517 = vsyncadd [#allocation4], 896  ;;  %s1722_s1 = smov [#allocation7]  }
 0x12d   :  { %s1518_s8 = sshll.u32 %s1722_s1, 4  ;;  %s1519_s8 = int_to_ptr.vmem [resolvable:$true] %s1518_s8 }
 0x12e   :  { %s1683_s9 = scalar_lea.vmem %s1519_s8, 128  ;;  %s1687_s10 = scalar_lea.vmem %s1519_s8, 1024 }
 0x12f   :  { %p1684_p2 = scmp.ne.s32.totalorder %s1519_s8, %s1683_s9  ;;  %p1688_p3 = scmp.lt.s32.totalorder %s1519_s8, %s1519_s8 }
 0x130   :  { %p1689_p4 = scmp.lt.s32.totalorder %s1687_s10, %s1683_s9 }
 0x132   :  { %p1690_p5 = por %p1689_p4, %p1688_p3 }
 0x134   :  { %p1691_p6 = pnand %p1690_p5, %p1684_p2 }
 0x136   :  { %1694 = shalt.err (!%p1691_p6)
}
 0x137   :  { %s1695_s13 = scalar_lea.hbm %s2801_s2, 128 }
 0x138   :  { %p1696_p7 = scmp.ne.s32.totalorder %s2801_s2, %s1695_s13  ;;  %p1699_p8 = scmp.lt.u32.totalorder %s1695_s13, %s2801_s2 }
 0x13a   :  { %p1701_p9 = pnand %p1699_p8, %p1696_p7 }
 0x13c   :  { %1704 = shalt.err (!%p1701_p9)
}
 0x13d   :  { %1524 = dma.vmem_to_hbm [thread:$0]  %s1519_s8, 128, %s2801_s2, [#allocation4], %s1712_s20, %s1712_s20, %s1713_s21  }
 0x13e   :  { %1709 = dma.done.wait [#allocation4], 1024  }
 0x13f   :  { %1710 = vsyncadd [#allocation4], 4294966272 }
 0x140   :  { %1528 = vsyncpa [#allocation3], 1 }
 0x141   :  { %1529 = vsyncpa [#allocation6], 1 }
 0x142   :  { %1530 = vsyncpa [#allocation4], 1 }

</bundles_post_ra>
